<compile_context>
chip_gen: v7x
topology: tpu7x:2x2x1
jax: 0.10.0
libtpu: 0.0.40
codegen_flags: <defaults>
</compile_context>

<pallas_src>
from functools import partial

import jax
import jax.numpy as jnp
from jax import lax
from jax.experimental import pallas as pl
from jax.experimental.pallas import tpu as pltpu


def _round_up(x, m):
    return (x + m - 1) // m * m


def fold_bn(gamma, beta, mean, var, eps=1e-5):
    scale = gamma / jnp.sqrt(var + eps)
    bias = beta - mean * scale
    return scale, bias


def _prefer_grouped_conv2():
    """dx-grouped K=3*Cm conv2 taps on 256-deep-MXU chips (v6e/v7x); 9 K=Cm taps
    elsewhere (v5e and older have a 128-deep MXU and the lane-concat only adds
    vld/vst traffic there)."""
    try:
        kind = jax.devices()[0].device_kind.lower()
    except Exception:
        return False
    return any(tag in kind for tag in ("v6", "v7", "tpu7", "7x"))


# ------------------------------ fused kernel --------------------------------

def _bottleneck_kernel(x_ref, w1_ref, b1_ref, w2_ref, b2_ref, w3_ref, b3_ref,
                       mlo_ref, mhi_ref, o_ref, p1_ref, *, H, W, pad, group_dx):
    """One batch image per grid step.

    x_ref : (HW, Cp)       bf16 flattened NHWC image (lane-padded channels)
    w2_ref: (3, 3*Cm, Cm)  bf16 3x3 taps grouped by dx (g = dx+1), rows blocked by dy
    p1_ref: (HW+2*pad, Cm) bf16 zero-halo scratch holding out1
    """
    HW = H * W
    Cm = w1_ref.shape[1]
    f32 = jnp.float32

    # Zero only the two halo bands (2*pad rows, cheap). The interior is fully
    # overwritten every step; bands are re-zeroed per step instead of once under
    # pl.when(program_id==0) so megacore "parallel" batch sharding stays correct
    # (a core that never sees grid step 0 would otherwise read stale halo data).
    p1_ref[0:pad, :] = jnp.zeros((pad, Cm), p1_ref.dtype)
    p1_ref[pad + HW:HW + 2 * pad, :] = jnp.zeros((pad, Cm), p1_ref.dtype)

    # ---- conv1 (1x1, BN-scale folded into w1) + bias + ReLU ------------------
    o1 = jnp.dot(x_ref[...], w1_ref[...], preferred_element_type=f32)
    o1 = jnp.maximum(o1 + b1_ref[...], 0.0)
    # Single bf16 cast + aligned store (pad % 16 == 0); read 9x below w/o casts.
    p1_ref[pad:pad + HW, :] = o1.astype(p1_ref.dtype)

    mask_lo = mlo_ref[...]        # (HW,1): 0 where the dx=-1 tap wraps (col == 0)
    mask_hi = mhi_ref[...]        # (HW,1): 0 where the dx=+1 tap wraps (col == W-1)

    def win(dy, dx):
        # Shifted window of out1 over the zero-halo scratch: row halo = zero
        # bands, column wrap handled by mask_lo/mask_hi on the tap outputs.
        s = pad + dy * W + dx     # static per unrolled tap
        return p1_ref[s:s + HW, :]

    # ---- conv2 (3x3, pad=1) as accumulated shifted-window matmuls ------------
    if group_dx:
        # v6e/v7x: 3 matmuls with K = 3*Cm (fills the 256-deep MXU); one mask
        # multiply per dx group, two accumulator adds total.
        parts = []
        for g, dx in enumerate((-1, 0, 1)):
            big = jnp.concatenate([win(-1, dx), win(0, dx), win(1, dx)], axis=1)
            parts.append(jnp.dot(big, w2_ref[g], preferred_element_type=f32))
        acc = parts[1] + parts[0] * mask_lo + parts[2] * mask_hi
    else:
        # v5e / older: 9 taps with K = Cm (matches the 128-deep MXU; avoids the
        # lane-concat copy).  dx=-1/+1 taps accumulate separately so each wrap
        # mask is applied exactly once.
        acc_c = acc_m = acc_p = None
        for dyi, dy in enumerate((-1, 0, 1)):
            lo, hi = dyi * Cm, (dyi + 1) * Cm
            p_c = jnp.dot(win(dy, 0), w2_ref[1, lo:hi, :], preferred_element_type=f32)
            p_m = jnp.dot(win(dy, -1), w2_ref[0, lo:hi, :], preferred_element_type=f32)
            p_p = jnp.dot(win(dy, 1), w2_ref[2, lo:hi, :], preferred_element_type=f32)
            acc_c = p_c if acc_c is None else acc_c + p_c
            acc_m = p_m if acc_m is None else acc_m + p_m
            acc_p = p_p if acc_p is None else acc_p + p_p
        acc = acc_c + acc_m * mask_lo + acc_p * mask_hi

    o2 = jnp.maximum(acc + b2_ref[...], 0.0).astype(jnp.bfloat16)

    # ---- conv3 (1x1) + bias + identity residual + ReLU -----------------------
    # x is re-read here (short live range; its pipeline VMEM buffer is resident)
    # instead of being held as an (HW, Cp) temporary across conv2.
    o3 = jnp.dot(o2, w3_ref[...], preferred_element_type=f32)
    o3 = o3 + b3_ref[...] + x_ref[...].astype(f32)
    o_ref[...] = jnp.maximum(o3, 0.0).astype(o_ref.dtype)


# ------------------------------ host wrapper ---------------------------------

def bottleneck_forward(x_nhwc, params, stride=1, group_dx=None):
    """Fused Bottleneck forward.  x: (N, H, W, Cin), identity residual."""
    assert stride == 1, "only stride=1 / downsample=None (identity residual) supported"
    N, H, W, Cin = x_nhwc.shape
    w1, w2, w3 = params["w1"], params["w2"], params["w3"]
    s1, b1 = params["bn1"]
    s2, b2 = params["bn2"]
    s3, b3 = params["bn3"]
    Cmid = w1.shape[1]
    Cout = w3.shape[1]
    assert Cin == Cout, "identity residual requires inplanes == planes * expansion"
    if group_dx is None:
        group_dx = _prefer_grouped_conv2()

    LANE = 128
    Cp = _round_up(Cin, LANE)          # padded in/out channels (== residual width)
    Cm = _round_up(Cmid, LANE)         # padded mid channels (VMEM-only)
    HW = H * W
    PAD = _round_up(W + 1, 16)         # halo rows; multiple of 16 keeps the bf16
                                       # interior scratch store tile-aligned

    f32, bf16 = jnp.float32, jnp.bfloat16

    # Fold BN scale into conv weights, zero-pad channels, cast weights to bf16.
    w1f = jnp.pad(w1 * s1[None, :], ((0, Cp - Cin), (0, Cm - Cmid))).astype(bf16)
    w2f = jnp.pad(w2 * s2[None, None, None, :],
                  ((0, 0), (0, 0), (0, Cm - Cmid), (0, Cm - Cmid)))          # (ky,kx,ci,co)
    w2g = jnp.transpose(w2f, (1, 0, 2, 3)).reshape(3, 3 * Cm, Cm).astype(bf16)  # [dx, dy*Cm+ci, co]
    w3f = jnp.pad(w3 * s3[None, :], ((0, Cm - Cmid), (0, Cp - Cout))).astype(bf16)
    b1p = jnp.pad(b1, (0, Cm - Cmid)).reshape(1, Cm).astype(f32)
    b2p = jnp.pad(b2, (0, Cm - Cmid)).reshape(1, Cm).astype(f32)
    b3p = jnp.pad(b3, (0, Cp - Cout)).reshape(1, Cp).astype(f32)

    # Lane-pad the activation and cast to bf16 once: the kernel is HBM-bound on
    # every generation, so bf16 in / bf16 out halves activation traffic.  All
    # accumulation and the residual add stay f32 inside the kernel.
    xp = jnp.pad(x_nhwc, ((0, 0), (0, 0), (0, 0), (0, Cp - Cin)))
    xp = xp.reshape(N, HW, Cp).astype(bf16)

    # Column-wrap masks for the dx = -1 / +1 taps of the 3x3 conv.
    col = jnp.arange(HW, dtype=jnp.int32) % W
    mask_lo = (col >= 1).astype(f32).reshape(HW, 1)
    mask_hi = (col <= W - 2).astype(f32).reshape(HW, 1)

    flops = 2 * N * HW * (Cp * Cm + 9 * Cm * Cm + Cm * Cp)
    bytes_accessed = (2 * N * HW * Cp) * 2 \
        + (w1f.size + w2g.size + w3f.size) * 2 \
        + (b1p.size + b2p.size + b3p.size) * 4 + 2 * HW * 4

    # VMEM budget: double-buffered bf16 x/out blocks + weights, the bf16 halo
    # scratch, and the in-kernel f32/bf16 working values; the cap leaves headroom
    # for Mosaic internal scratch (v7x has only 64 MiB physical VMEM per core).
    est = (2 * 2 * HW * Cp * 2                       # double-buffered x + out blocks (bf16)
           + 2 * (w1f.size + w2g.size + w3f.size) * 2
           + (b1p.size + b2p.size + b3p.size + 2 * HW) * 4
           + (HW + 2 * PAD) * Cm * 2                 # bf16 out1 halo scratch
           + HW * Cm * 8 + HW * 3 * Cm * 4           # f32 o1/acc + grouped-concat temps
           + (1 << 20))
    vmem_limit = int(min(44 * 2 ** 20, max(24 * 2 ** 20, 2 * est)))

    kernel = partial(_bottleneck_kernel, H=H, W=W, pad=PAD, group_dx=bool(group_dx))
    out = pl.pallas_call(
        kernel,
        out_shape=jax.ShapeDtypeStruct((N, HW, Cp), bf16),
        grid=(N,),
        in_specs=[
            pl.BlockSpec((None, HW, Cp), lambda n: (n, 0, 0)),   # x (per image)
            pl.BlockSpec((Cp, Cm), lambda n: (0, 0)),            # w1 (BN folded)
            pl.BlockSpec((1, Cm), lambda n: (0, 0)),             # b1
            pl.BlockSpec((3, 3 * Cm, Cm), lambda n: (0, 0, 0)),  # w2 taps (dx-grouped)
            pl.BlockSpec((1, Cm), lambda n: (0, 0)),             # b2
            pl.BlockSpec((Cm, Cp), lambda n: (0, 0)),            # w3 (BN folded)
            pl.BlockSpec((1, Cp), lambda n: (0, 0)),             # b3
            pl.BlockSpec((HW, 1), lambda n: (0, 0)),             # mask dx=-1
            pl.BlockSpec((HW, 1), lambda n: (0, 0)),             # mask dx=+1
        ],
        out_specs=pl.BlockSpec((None, HW, Cp), lambda n: (n, 0, 0)),
        scratch_shapes=[pltpu.VMEM((HW + 2 * PAD, Cm), bf16)],
        compiler_params=pltpu.CompilerParams(
            dimension_semantics=("parallel",),
            vmem_limit_bytes=vmem_limit,
        ),
        cost_estimate=pl.CostEstimate(flops=int(flops), transcendentals=0,
                                      bytes_accessed=int(bytes_accessed)),
    )(xp, w1f, b1p, w2g, b2p, w3f, b3p, mask_lo, mask_hi)

    out = out.reshape(N, H, W, Cp)[..., :Cout]
    return out.astype(x_nhwc.dtype)


# ------------------------------ JAX reference ---------------------------------

def bottleneck_reference(x_nhwc, params, compute_dtype=jnp.float32):
    """Pure-XLA reference (eval-mode BN).  compute_dtype=bfloat16 mirrors the
    kernel's numerics (BN scale folded into weights, bf16 operands incl. the
    residual, f32 accumulation)."""
    dn = ("NHWC", "HWIO", "NHWC")
    w1, w2, w3 = params["w1"], params["w2"], params["w3"]
    s1, b1 = params["bn1"]
    s2, b2 = params["bn2"]
    s3, b3 = params["bn3"]
    Cin, Cmid = w1.shape
    Cout = w3.shape[1]
    cd = compute_dtype

    w1f = (w1 * s1[None, :]).reshape(1, 1, Cin, Cmid).astype(cd)
    w2f = (w2 * s2[None, None, None, :]).astype(cd)
    w3f = (w3 * s3[None, :]).reshape(1, 1, Cmid, Cout).astype(cd)
    xin = x_nhwc.astype(cd)

    def conv(a, w, pad):
        return lax.conv_general_dilated(a.astype(cd), w, (1, 1), pad,
                                        dimension_numbers=dn,
                                        preferred_element_type=jnp.float32)

    o = jnp.maximum(conv(xin, w1f, "VALID") + b1, 0.0)
    o = jnp.maximum(conv(o, w2f, ((1, 1), (1, 1))) + b2, 0.0)
    o = conv(o, w3f, "VALID") + b3 + xin.astype(jnp.float32)
    return jnp.maximum(o, 0.0)


# ----------------------------------- main -------------------------------------

if __name__ == "__main__":
    key = jax.random.PRNGKey(0)
    N, H, W = 2, 16, 16
    planes = 4
    inplanes = planes * 4   # identity residual requires inplanes == planes * expansion
    stride = 1

    ks = jax.random.split(key, 16)
    x = jax.random.normal(ks[0], (N, H, W, inplanes), jnp.float32)

    w1 = 0.2 * jax.random.normal(ks[1], (inplanes, planes), jnp.float32)
    w2 = 0.2 * jax.random.normal(ks[2], (3, 3, planes, planes), jnp.float32)
    w3 = 0.2 * jax.random.normal(ks[3], (planes, planes * 4), jnp.float32)

    def bn(kg, kb, km, kv, c):
        gamma = 1.0 + 0.1 * jax.random.normal(kg, (c,), jnp.float32)
        beta = 0.1 * jax.random.normal(kb, (c,), jnp.float32)
        mean = 0.1 * jax.random.normal(km, (c,), jnp.float32)
        var = jnp.abs(jax.random.normal(kv, (c,), jnp.float32)) + 0.5
        return fold_bn(gamma, beta, mean, var)

    params = {
        "w1": w1, "w2": w2, "w3": w3,
        "bn1": bn(ks[4], ks[5], ks[6], ks[7], planes),
        "bn2": bn(ks[8], ks[9], ks[10], ks[11], planes),
        "bn3": bn(ks[12], ks[13], ks[14], ks[15], planes * 4),
    }

    fwd = jax.jit(bottleneck_forward, static_argnames=("stride", "group_dx"))
    out = jax.block_until_ready(fwd(x, params, stride=stride))
    out = out.astype(jnp.float32)

    # Tight check vs a reference mirroring the kernel numerics (bf16 operands,
    # bf16-rounded residual x, f32 accumulation).
    ref_bf16 = jax.block_until_ready(
        bottleneck_reference(x, params, compute_dtype=jnp.bfloat16))
    assert out.shape == ref_bf16.shape
    assert bool(jnp.allclose(out, ref_bf16, atol=2e-2, rtol=2e-2)), \
        "mismatch vs bf16-operand JAX reference"

    # Semantics sanity check vs the pure-f32 module reference (loose tolerance:
    # the kernel intentionally uses bf16 MXU operands and bf16 HBM activations).
    ref_f32 = jax.block_until_ready(
        bottleneck_reference(x, params, compute_dtype=jnp.float32))
    assert bool(jnp.allclose(out, ref_f32, atol=1e-1, rtol=1e-1)), \
        "mismatch vs f32 JAX reference"

    print("KERNEL_OK")
</pallas_src>

<mosaic_0001>
module attributes {stable_mosaic.version = 11 : i64} {
  func.func @_bottleneck_kernel(%arg0: i32, %arg1: memref<1x256x128xbf16, #tpu.memory_space<vmem>>, %arg2: memref<128x128xbf16, #tpu.memory_space<vmem>>, %arg3: memref<1x128xf32, #tpu.memory_space<vmem>>, %arg4: memref<3x384x128xbf16, #tpu.memory_space<vmem>>, %arg5: memref<1x128xf32, #tpu.memory_space<vmem>>, %arg6: memref<128x128xbf16, #tpu.memory_space<vmem>>, %arg7: memref<1x128xf32, #tpu.memory_space<vmem>>, %arg8: memref<256x1xf32, #tpu.memory_space<vmem>>, %arg9: memref<256x1xf32, #tpu.memory_space<vmem>>, %arg10: memref<1x256x128xbf16, #tpu.memory_space<vmem>>, %arg11: memref<320x128xbf16, #tpu.memory_space<vmem>>) attributes {dimension_semantics = [#tpu.dimension_semantics<parallel>], iteration_bounds = array<i64: 2>, scalar_prefetch = 0 : i64, scratch_operands = 1 : i64, tpu.core_type = #tpu.core_type<tc>, window_params = [{transform_indices = @transform_0, window_bounds = array<i64: 1, 256, 128>}, {pipeline_mode = #tpu.pipeline_mode<synchronous>, transform_indices = @transform_1, window_bounds = array<i64: 128, 128>}, {pipeline_mode = #tpu.pipeline_mode<synchronous>, transform_indices = @transform_2, window_bounds = array<i64: 1, 128>}, {pipeline_mode = #tpu.pipeline_mode<synchronous>, transform_indices = @transform_3, window_bounds = array<i64: 3, 384, 128>}, {pipeline_mode = #tpu.pipeline_mode<synchronous>, transform_indices = @transform_4, window_bounds = array<i64: 1, 128>}, {pipeline_mode = #tpu.pipeline_mode<synchronous>, transform_indices = @transform_5, window_bounds = array<i64: 128, 128>}, {pipeline_mode = #tpu.pipeline_mode<synchronous>, transform_indices = @transform_6, window_bounds = array<i64: 1, 128>}, {pipeline_mode = #tpu.pipeline_mode<synchronous>, transform_indices = @transform_7, window_bounds = array<i64: 256, 1>}, {pipeline_mode = #tpu.pipeline_mode<synchronous>, transform_indices = @transform_8, window_bounds = array<i64: 256, 1>}, {transform_indices = @transform_9, window_bounds = array<i64: 1, 256, 128>}]} {
    %cst = arith.constant 0.000000e+00 : bf16
    %0 = vector.broadcast %cst : bf16 to vector<32x128xbf16>
    %c0 = arith.constant 0 : index
    %c0_0 = arith.constant 0 : index
    %1 = vector.load %arg11[%c0, %c0_0] : memref<320x128xbf16, #tpu.memory_space<vmem>>, vector<32x128xbf16>
    tpu.vector_store %arg11[%c0, %c0_0], %0 {strides = array<i32>} : memref<320x128xbf16, #tpu.memory_space<vmem>>, vector<32x128xbf16>,
    %cst_1 = arith.constant 0.000000e+00 : bf16
    %2 = vector.broadcast %cst_1 : bf16 to vector<32x128xbf16>
    %c288 = arith.constant 288 : index
    %c0_2 = arith.constant 0 : index
    %3 = vector.load %arg11[%c288, %c0_2] : memref<320x128xbf16, #tpu.memory_space<vmem>>, vector<32x128xbf16>
    tpu.vector_store %arg11[%c288, %c0_2], %2 {strides = array<i32>} : memref<320x128xbf16, #tpu.memory_space<vmem>>, vector<32x128xbf16>,
    %c0_3 = arith.constant 0 : index
    %c0_4 = arith.constant 0 : index
    %c0_5 = arith.constant 0 : index
    %4 = vector.load %arg1[%c0_3, %c0_4, %c0_5] : memref<1x256x128xbf16, #tpu.memory_space<vmem>>, vector<1x256x128xbf16>
    %5 = vector.shape_cast %4 : vector<1x256x128xbf16> to vector<256x128xbf16>
    %c0_6 = arith.constant 0 : index
    %c0_7 = arith.constant 0 : index
    %6 = vector.load %arg2[%c0_6, %c0_7] : memref<128x128xbf16, #tpu.memory_space<vmem>>, vector<128x128xbf16>
    %cst_8 = arith.constant dense<0.000000e+00> : vector<256x128xf32>
    %7 = tpu.matmul %5, %6, %cst_8 {dimension_numbers = #tpu.dot_dimension_numbers<[1], [0], [0], [1], [0, 0, 1, 1], [], []>} : vector<256x128xbf16>, vector<128x128xbf16>, vector<256x128xf32> -> vector<256x128xf32>
    %c0_9 = arith.constant 0 : index
    %c0_10 = arith.constant 0 : index
    %8 = vector.load %arg3[%c0_9, %c0_10] : memref<1x128xf32, #tpu.memory_space<vmem>>, vector<1x128xf32>
    %9 = vector.broadcast %8 : vector<1x128xf32> to vector<256x128xf32>
    %10 = arith.addf %7, %9 : vector<256x128xf32>
    %cst_11 = arith.constant 0.000000e+00 : f32
    %11 = vector.broadcast %cst_11 : f32 to vector<256x128xf32>
    %12 = arith.maximumf %10, %11 : vector<256x128xf32>
    %13 = arith.truncf %12 : vector<256x128xf32> to vector<256x128xbf16>
    %c32 = arith.constant 32 : index
    %c0_12 = arith.constant 0 : index
    %14 = vector.load %arg11[%c32, %c0_12] : memref<320x128xbf16, #tpu.memory_space<vmem>>, vector<256x128xbf16>
    tpu.vector_store %arg11[%c32, %c0_12], %13 {strides = array<i32>} : memref<320x128xbf16, #tpu.memory_space<vmem>>, vector<256x128xbf16>,
    %c0_13 = arith.constant 0 : index
    %c0_14 = arith.constant 0 : index
    %15 = vector.load %arg8[%c0_13, %c0_14] : memref<256x1xf32, #tpu.memory_space<vmem>>, vector<256x1xf32>
    %c0_15 = arith.constant 0 : index
    %c0_16 = arith.constant 0 : index
    %16 = vector.load %arg9[%c0_15, %c0_16] : memref<256x1xf32, #tpu.memory_space<vmem>>, vector<256x1xf32>
    %c16 = arith.constant 16 : index
    %c0_17 = arith.constant 0 : index
    %17 = vector.load %arg11[%c16, %c0_17] : memref<320x128xbf16, #tpu.memory_space<vmem>>, vector<256x128xbf16>
    %c1 = arith.constant 1 : index
    %c0_18 = arith.constant 0 : index
    %c0_19 = arith.constant 0 : index
    %18 = vector.load %arg4[%c1, %c0_18, %c0_19] : memref<3x384x128xbf16, #tpu.memory_space<vmem>>, vector<1x128x128xbf16>
    %19 = vector.shape_cast %18 : vector<1x128x128xbf16> to vector<128x128xbf16>
    %cst_20 = arith.constant dense<0.000000e+00> : vector<256x128xf32>
    %20 = tpu.matmul %17, %19, %cst_20 {dimension_numbers = #tpu.dot_dimension_numbers<[1], [0], [0], [1], [0, 0, 1, 1], [], []>} : vector<256x128xbf16>, vector<128x128xbf16>, vector<256x128xf32> -> vector<256x128xf32>
    %c15 = arith.constant 15 : index
    %c0_21 = arith.constant 0 : index
    %21 = vector.load %arg11[%c15, %c0_21] : memref<320x128xbf16, #tpu.memory_space<vmem>>, vector<256x128xbf16>
    %c0_22 = arith.constant 0 : index
    %c0_23 = arith.constant 0 : index
    %c0_24 = arith.constant 0 : index
    %22 = vector.load %arg4[%c0_22, %c0_23, %c0_24] : memref<3x384x128xbf16, #tpu.memory_space<vmem>>, vector<1x128x128xbf16>
    %23 = vector.shape_cast %22 : vector<1x128x128xbf16> to vector<128x128xbf16>
    %cst_25 = arith.constant dense<0.000000e+00> : vector<256x128xf32>
    %24 = tpu.matmul %21, %23, %cst_25 {dimension_numbers = #tpu.dot_dimension_numbers<[1], [0], [0], [1], [0, 0, 1, 1], [], []>} : vector<256x128xbf16>, vector<128x128xbf16>, vector<256x128xf32> -> vector<256x128xf32>
    %c17 = arith.constant 17 : index
    %c0_26 = arith.constant 0 : index
    %25 = vector.load %arg11[%c17, %c0_26] : memref<320x128xbf16, #tpu.memory_space<vmem>>, vector<256x128xbf16>
    %c2 = arith.constant 2 : index
    %c0_27 = arith.constant 0 : index
    %c0_28 = arith.constant 0 : index
    %26 = vector.load %arg4[%c2, %c0_27, %c0_28] : memref<3x384x128xbf16, #tpu.memory_space<vmem>>, vector<1x128x128xbf16>
    %27 = vector.shape_cast %26 : vector<1x128x128xbf16> to vector<128x128xbf16>
    %cst_29 = arith.constant dense<0.000000e+00> : vector<256x128xf32>
    %28 = tpu.matmul %25, %27, %cst_29 {dimension_numbers = #tpu.dot_dimension_numbers<[1], [0], [0], [1], [0, 0, 1, 1], [], []>} : vector<256x128xbf16>, vector<128x128xbf16>, vector<256x128xf32> -> vector<256x128xf32>
    %c32_30 = arith.constant 32 : index
    %c0_31 = arith.constant 0 : index
    %29 = vector.load %arg11[%c32_30, %c0_31] : memref<320x128xbf16, #tpu.memory_space<vmem>>, vector<256x128xbf16>
    %c1_32 = arith.constant 1 : index
    %c128 = arith.constant 128 : index
    %c0_33 = arith.constant 0 : index
    %30 = vector.load %arg4[%c1_32, %c128, %c0_33] : memref<3x384x128xbf16, #tpu.memory_space<vmem>>, vector<1x128x128xbf16>
    %31 = vector.shape_cast %30 : vector<1x128x128xbf16> to vector<128x128xbf16>
    %cst_34 = arith.constant dense<0.000000e+00> : vector<256x128xf32>
    %32 = tpu.matmul %29, %31, %cst_34 {dimension_numbers = #tpu.dot_dimension_numbers<[1], [0], [0], [1], [0, 0, 1, 1], [], []>} : vector<256x128xbf16>, vector<128x128xbf16>, vector<256x128xf32> -> vector<256x128xf32>
    %c31 = arith.constant 31 : index
    %c0_35 = arith.constant 0 : index
    %33 = vector.load %arg11[%c31, %c0_35] : memref<320x128xbf16, #tpu.memory_space<vmem>>, vector<256x128xbf16>
    %c0_36 = arith.constant 0 : index
    %c128_37 = arith.constant 128 : index
    %c0_38 = arith.constant 0 : index
    %34 = vector.load %arg4[%c0_36, %c128_37, %c0_38] : memref<3x384x128xbf16, #tpu.memory_space<vmem>>, vector<1x128x128xbf16>
    %35 = vector.shape_cast %34 : vector<1x128x128xbf16> to vector<128x128xbf16>
    %cst_39 = arith.constant dense<0.000000e+00> : vector<256x128xf32>
    %36 = tpu.matmul %33, %35, %cst_39 {dimension_numbers = #tpu.dot_dimension_numbers<[1], [0], [0], [1], [0, 0, 1, 1], [], []>} : vector<256x128xbf16>, vector<128x128xbf16>, vector<256x128xf32> -> vector<256x128xf32>
    %c33 = arith.constant 33 : index
    %c0_40 = arith.constant 0 : index
    %37 = vector.load %arg11[%c33, %c0_40] : memref<320x128xbf16, #tpu.memory_space<vmem>>, vector<256x128xbf16>
    %c2_41 = arith.constant 2 : index
    %c128_42 = arith.constant 128 : index
    %c0_43 = arith.constant 0 : index
    %38 = vector.load %arg4[%c2_41, %c128_42, %c0_43] : memref<3x384x128xbf16, #tpu.memory_space<vmem>>, vector<1x128x128xbf16>
    %39 = vector.shape_cast %38 : vector<1x128x128xbf16> to vector<128x128xbf16>
    %cst_44 = arith.constant dense<0.000000e+00> : vector<256x128xf32>
    %40 = tpu.matmul %37, %39, %cst_44 {dimension_numbers = #tpu.dot_dimension_numbers<[1], [0], [0], [1], [0, 0, 1, 1], [], []>} : vector<256x128xbf16>, vector<128x128xbf16>, vector<256x128xf32> -> vector<256x128xf32>
    %41 = arith.addf %20, %32 : vector<256x128xf32>
    %42 = arith.addf %24, %36 : vector<256x128xf32>
    %43 = arith.addf %28, %40 : vector<256x128xf32>
    %c48 = arith.constant 48 : index
    %c0_45 = arith.constant 0 : index
    %44 = vector.load %arg11[%c48, %c0_45] : memref<320x128xbf16, #tpu.memory_space<vmem>>, vector<256x128xbf16>
    %c1_46 = arith.constant 1 : index
    %c256 = arith.constant 256 : index
    %c0_47 = arith.constant 0 : index
    %45 = vector.load %arg4[%c1_46, %c256, %c0_47] : memref<3x384x128xbf16, #tpu.memory_space<vmem>>, vector<1x128x128xbf16>
    %46 = vector.shape_cast %45 : vector<1x128x128xbf16> to vector<128x128xbf16>
    %cst_48 = arith.constant dense<0.000000e+00> : vector<256x128xf32>
    %47 = tpu.matmul %44, %46, %cst_48 {dimension_numbers = #tpu.dot_dimension_numbers<[1], [0], [0], [1], [0, 0, 1, 1], [], []>} : vector<256x128xbf16>, vector<128x128xbf16>, vector<256x128xf32> -> vector<256x128xf32>
    %c47 = arith.constant 47 : index
    %c0_49 = arith.constant 0 : index
    %48 = vector.load %arg11[%c47, %c0_49] : memref<320x128xbf16, #tpu.memory_space<vmem>>, vector<256x128xbf16>
    %c0_50 = arith.constant 0 : index
    %c256_51 = arith.constant 256 : index
    %c0_52 = arith.constant 0 : index
    %49 = vector.load %arg4[%c0_50, %c256_51, %c0_52] : memref<3x384x128xbf16, #tpu.memory_space<vmem>>, vector<1x128x128xbf16>
    %50 = vector.shape_cast %49 : vector<1x128x128xbf16> to vector<128x128xbf16>
    %cst_53 = arith.constant dense<0.000000e+00> : vector<256x128xf32>
    %51 = tpu.matmul %48, %50, %cst_53 {dimension_numbers = #tpu.dot_dimension_numbers<[1], [0], [0], [1], [0, 0, 1, 1], [], []>} : vector<256x128xbf16>, vector<128x128xbf16>, vector<256x128xf32> -> vector<256x128xf32>
    %c49 = arith.constant 49 : index
    %c0_54 = arith.constant 0 : index
    %52 = vector.load %arg11[%c49, %c0_54] : memref<320x128xbf16, #tpu.memory_space<vmem>>, vector<256x128xbf16>
    %c2_55 = arith.constant 2 : index
    %c256_56 = arith.constant 256 : index
    %c0_57 = arith.constant 0 : index
    %53 = vector.load %arg4[%c2_55, %c256_56, %c0_57] : memref<3x384x128xbf16, #tpu.memory_space<vmem>>, vector<1x128x128xbf16>
    %54 = vector.shape_cast %53 : vector<1x128x128xbf16> to vector<128x128xbf16>
    %cst_58 = arith.constant dense<0.000000e+00> : vector<256x128xf32>
    %55 = tpu.matmul %52, %54, %cst_58 {dimension_numbers = #tpu.dot_dimension_numbers<[1], [0], [0], [1], [0, 0, 1, 1], [], []>} : vector<256x128xbf16>, vector<128x128xbf16>, vector<256x128xf32> -> vector<256x128xf32>
    %56 = arith.addf %41, %47 : vector<256x128xf32>
    %57 = arith.addf %42, %51 : vector<256x128xf32>
    %58 = arith.addf %43, %55 : vector<256x128xf32>
    %59 = vector.broadcast %15 : vector<256x1xf32> to vector<256x128xf32>
    %60 = arith.mulf %57, %59 : vector<256x128xf32>
    %61 = arith.addf %56, %60 : vector<256x128xf32>
    %62 = vector.broadcast %16 : vector<256x1xf32> to vector<256x128xf32>
    %63 = arith.mulf %58, %62 : vector<256x128xf32>
    %64 = arith.addf %61, %63 : vector<256x128xf32>
    %c0_59 = arith.constant 0 : index
    %c0_60 = arith.constant 0 : index
    %65 = vector.load %arg5[%c0_59, %c0_60] : memref<1x128xf32, #tpu.memory_space<vmem>>, vector<1x128xf32>
    %66 = vector.broadcast %65 : vector<1x128xf32> to vector<256x128xf32>
    %67 = arith.addf %64, %66 : vector<256x128xf32>
    %cst_61 = arith.constant 0.000000e+00 : f32
    %68 = vector.broadcast %cst_61 : f32 to vector<256x128xf32>
    %69 = arith.maximumf %67, %68 : vector<256x128xf32>
    %70 = arith.truncf %69 : vector<256x128xf32> to vector<256x128xbf16>
    %c0_62 = arith.constant 0 : index
    %c0_63 = arith.constant 0 : index
    %71 = vector.load %arg6[%c0_62, %c0_63] : memref<128x128xbf16, #tpu.memory_space<vmem>>, vector<128x128xbf16>
    %cst_64 = arith.constant dense<0.000000e+00> : vector<256x128xf32>
    %72 = tpu.matmul %70, %71, %cst_64 {dimension_numbers = #tpu.dot_dimension_numbers<[1], [0], [0], [1], [0, 0, 1, 1], [], []>} : vector<256x128xbf16>, vector<128x128xbf16>, vector<256x128xf32> -> vector<256x128xf32>
    %c0_65 = arith.constant 0 : index
    %c0_66 = arith.constant 0 : index
    %73 = vector.load %arg7[%c0_65, %c0_66] : memref<1x128xf32, #tpu.memory_space<vmem>>, vector<1x128xf32>
    %74 = vector.broadcast %73 : vector<1x128xf32> to vector<256x128xf32>
    %75 = arith.addf %72, %74 : vector<256x128xf32>
    %c0_67 = arith.constant 0 : index
    %c0_68 = arith.constant 0 : index
    %c0_69 = arith.constant 0 : index
    %76 = vector.load %arg1[%c0_67, %c0_68, %c0_69] : memref<1x256x128xbf16, #tpu.memory_space<vmem>>, vector<1x256x128xbf16>
    %77 = vector.shape_cast %76 : vector<1x256x128xbf16> to vector<256x128xbf16>
    %78 = arith.extf %77 : vector<256x128xbf16> to vector<256x128xf32>
    %79 = arith.addf %75, %78 : vector<256x128xf32>
    %cst_70 = arith.constant 0.000000e+00 : f32
    %80 = vector.broadcast %cst_70 : f32 to vector<256x128xf32>
    %81 = arith.maximumf %79, %80 : vector<256x128xf32>
    %82 = arith.truncf %81 : vector<256x128xf32> to vector<256x128xbf16>
    %c0_71 = arith.constant 0 : index
    %c0_72 = arith.constant 0 : index
    %c0_73 = arith.constant 0 : index
    %83 = vector.load %arg10[%c0_71, %c0_72, %c0_73] : memref<1x256x128xbf16, #tpu.memory_space<vmem>>, vector<1x256x128xbf16>
    %84 = vector.shape_cast %83 : vector<1x256x128xbf16> to vector<256x128xbf16>
    %85 = vector.shape_cast %82 : vector<256x128xbf16> to vector<1x256x128xbf16>
    tpu.vector_store %arg10[%c0_71, %c0_72, %c0_73], %85 {strides = array<i32>} : memref<1x256x128xbf16, #tpu.memory_space<vmem>>, vector<1x256x128xbf16>,
    return
  }
  func.func @transform_0(%arg0: i32) -> (i32, i32, i32) {
    %c0_i32 = arith.constant 0 : i32
    %c0_i32_0 = arith.constant 0 : i32
    %c0_i32_1 = arith.constant 0 : i32
    return %arg0, %c0_i32, %c0_i32_0 : i32, i32, i32
  }
  func.func @transform_1(%arg0: i32) -> (i32, i32) {
    %c0_i32 = arith.constant 0 : i32
    %c0_i32_0 = arith.constant 0 : i32
    %c0_i32_1 = arith.constant 0 : i32
    return %c0_i32, %c0_i32_0 : i32, i32
  }
  func.func @transform_2(%arg0: i32) -> (i32, i32) {
    %c0_i32 = arith.constant 0 : i32
    %c0_i32_0 = arith.constant 0 : i32
    %c0_i32_1 = arith.constant 0 : i32
    return %c0_i32, %c0_i32_0 : i32, i32
  }
  func.func @transform_3(%arg0: i32) -> (i32, i32, i32) {
    %c0_i32 = arith.constant 0 : i32
    %c0_i32_0 = arith.constant 0 : i32
    %c0_i32_1 = arith.constant 0 : i32
    %c0_i32_2 = arith.constant 0 : i32
    return %c0_i32, %c0_i32_0, %c0_i32_1 : i32, i32, i32
  }
  func.func @transform_4(%arg0: i32) -> (i32, i32) {
    %c0_i32 = arith.constant 0 : i32
    %c0_i32_0 = arith.constant 0 : i32
    %c0_i32_1 = arith.constant 0 : i32
    return %c0_i32, %c0_i32_0 : i32, i32
  }
  func.func @transform_5(%arg0: i32) -> (i32, i32) {
    %c0_i32 = arith.constant 0 : i32
    %c0_i32_0 = arith.constant 0 : i32
    %c0_i32_1 = arith.constant 0 : i32
    return %c0_i32, %c0_i32_0 : i32, i32
  }
  func.func @transform_6(%arg0: i32) -> (i32, i32) {
    %c0_i32 = arith.constant 0 : i32
    %c0_i32_0 = arith.constant 0 : i32
    %c0_i32_1 = arith.constant 0 : i32
    return %c0_i32, %c0_i32_0 : i32, i32
  }
  func.func @transform_7(%arg0: i32) -> (i32, i32) {
    %c0_i32 = arith.constant 0 : i32
    %c0_i32_0 = arith.constant 0 : i32
    %c0_i32_1 = arith.constant 0 : i32
    return %c0_i32, %c0_i32_0 : i32, i32
  }
  func.func @transform_8(%arg0: i32) -> (i32, i32) {
    %c0_i32 = arith.constant 0 : i32
    %c0_i32_0 = arith.constant 0 : i32
    %c0_i32_1 = arith.constant 0 : i32
    return %c0_i32, %c0_i32_0 : i32, i32
  }
  func.func @transform_9(%arg0: i32) -> (i32, i32, i32) {
    %c0_i32 = arith.constant 0 : i32
    %c0_i32_0 = arith.constant 0 : i32
    %c0_i32_1 = arith.constant 0 : i32
    return %arg0, %c0_i32, %c0_i32_0 : i32, i32, i32
  }
}

</mosaic_0001>

<bundles_post_ra>
// kernel: bottleneck_forward.1
= control target key start
LH: loop header
LB: loop body
LE: loop exit
PB: predicated region body
PF: predicated region fallthrough
CT: control target
= control target key end

     0   :  { %s6360_s30 = smov 0   ;;  %s7914_s0 = inlined_call_operand.vmem [shape: bf16[2,256,128], index: 0, kind: input, shape index: {}]   ;;  %s7915_s1 = inlined_call_operand.vmem [shape: bf16[128,128], index: 1, kind: input, shape index: {}]   ;;  %s7916_s2 = inlined_call_operand.vmem [shape: f32[1,128], index: 2, kind: input, shape index: {}]   ;;  %s7917_s3 = inlined_call_operand.vmem [shape: bf16[3,384,128], index: 3, kind: input, shape index: {}]   ;;  %s7918_s4 = inlined_call_operand.vmem [shape: f32[1,128], index: 4, kind: input, shape index: {}]   ;;  %s7919_s5 = inlined_call_operand.vmem [shape: bf16[128,128], index: 5, kind: input, shape index: {}]   ;;  %s7920_s6 = inlined_call_operand.vmem [shape: f32[1,128], index: 6, kind: input, shape index: {}]   ;;  %s7921_s7 = inlined_call_operand.vmem [shape: f32[256,1], index: 7, kind: input, shape index: {}]   ;;  %s7922_s8 = inlined_call_operand.vmem [shape: f32[256,1], index: 8, kind: input, shape index: {}]   ;;  %s7923_s9 = inlined_call_operand.vmem [shape: bf16[2,256,128], index: 9, kind: output, shape index: {}]  }
   0x1 LB: > { %s4717_s10 = sadd.s32 4294967295, %s6307_s30   ;;  %p4721_p0 = scmp.ge.s32.totalorder %s6307_s30, 1  ;;  %s6307_s30 = sphi %s6360_s30, %s19_s30  }
   0x2   : > { %p287_p1 = scmp.lt.s32.totalorder %s6307_s30, 3 }
   0x4   : > { %p288_p2 = pnand %p4721_p0, %p287_p1 }
   0x6   : > { %291 = sbr.rel (%p288_p2) target bundleno = 1094 (0x446), region = 56 }
   0xd   : > { %v6182_v0 = vld [vmem:[%s7915_s1] sm:$0xff]   ;;  %p323_p3 = scmp.lt.s32.totalorder %s4717_s10, 1  ;;  %v6183_v1 = vld [vmem:[%s7915_s1 + $0x8] sm:$0xff]   ;;  %v6184_v2 = vld [vmem:[%s7915_s1 + $0x10] sm:$0xff]   ;;  %v7924_v31 = vmov 0  }
   0xe   : > { %5435 = vmatprep.subr.bf16.mxu0 %v6182_v0  ;;  %v6185_v3 = vld [vmem:[%s7915_s1 + $0x18] sm:$0xff]   ;;  %v6186_v5 = vld [vmem:[%s7915_s1 + $0x20] sm:$0xff]   ;;  %v6187_v6 = vld [vmem:[%s7915_s1 + $0x28] sm:$0xff]   ;;  %335 = vst [vmem:[#allocation2 + $0x8] sm:$0xff] %v7924_v31  ;;  %6180 = vset.pattern.permute.xlu0 %v7924_v31  ;;  %v2319_v34 = vrot.slane %v7924_v31, 1 }
   0xf   : > { %s8005_s10 = smov (!%p323_p3, %s4717_s10), 1  ;;  %5436 = vmatpush3.bf16.msra.mxu0 %v6182_v0  ;;  %v6188_v7 = vld [vmem:[%s7915_s1 + $0x30] sm:$0xff]   ;;  %v6189_v8 = vld [vmem:[%s7915_s1 + $0x38] sm:$0xff]   ;;  %v6206_v9 = vld [vmem:[%s7917_s3 + $0x100] sm:$0xff]   ;;  %334 = vst [vmem:[#allocation2] sm:$0xff] %v7924_v31  ;;  %6181 = vset.pattern.permute.xlu1 %v7924_v31 }
  0x10   : > { %5437 = vmatprep.subr.bf16.mxu0 %v6183_v1  ;;  %s4963_s17 = sshll.u32 %s8005_s10, 7  ;;  %v6207_v10 = vld [vmem:[%s7917_s3 + $0x108] sm:$0xff]   ;;  %5963 = vmatprep.subr.bf16.mxu1 %v6206_v9  ;;  %v6208_v12 = vld [vmem:[%s7917_s3 + $0x110] sm:$0xff]   ;;  %v6209_v14 = vld [vmem:[%s7917_s3 + $0x118] sm:$0xff]   ;;  %336 = vst [vmem:[#allocation2 + $0x90] sm:$0xff] %v7924_v31 }
  0x11   : > { %s6385_s20 = scalar_lea.vmem %s7914_s0, %s4963_s17  ;;  %5971 = vmatpush3.bf16.msra.mxu1 %v6206_v9  ;;  %v6210_v28 = vld [vmem:[%s7917_s3 + $0x120] sm:$0xff]   ;;  %v6211_v29 = vld [vmem:[%s7917_s3 + $0x128] sm:$0xff]   ;;  %v6212_v30 = vld [vmem:[%s7917_s3 + $0x130] sm:$0xff]   ;;  %337 = vst [vmem:[#allocation2 + $0x98] sm:$0xff] %v7924_v31  ;;  %vm1528_vm0 = vsmask.f32 7424  ;;  %s7853_s21 = scalar_lea.vmem %s7923_s9, %s4963_s17 }
  0x12   : > { %v6190_v4 = vld [vmem:[%s6385_s20] sm:$0xff]   ;;  %v6191_v11 = vld [vmem:[%s6385_s20 + $0x8] sm:$0xff]   ;;  %5964 = vmatprep.subr.bf16.mxu1 %v6207_v10  ;;  %v6192_v13 = vld [vmem:[%s6385_s20 + $0x10] sm:$0xff]   ;;  %vm1137_vm1 = vsmask.f32 256 }
  0x13   : > { %5438 = vmatpush3.bf16.msra.mxu0 %v6183_v1  ;;  %5451 = vmatprep.mubr.bf16.mxu0 %v6190_v4  ;;  %v6193_v15 = vld [vmem:[%s6385_s20 + $0x18] sm:$0xff]   ;;  %v6194_v16 = vld [vmem:[%s6385_s20 + $0x20] sm:$0xff]   ;;  %v6195_v17 = vld [vmem:[%s6385_s20 + $0x28] sm:$0xff]  }
  0x14   : > { %5439 = vmatprep.subr.bf16.mxu0 %v6184_v2  ;;  %v6196_v18 = vld [vmem:[%s6385_s20 + $0x30] sm:$0xff]   ;;  %v6197_v19 = vld [vmem:[%s6385_s20 + $0x38] sm:$0xff]   ;;  %v6198_v20 = vld [vmem:[%s6385_s20 + $0x40] sm:$0xff]  }
  0x15   : > { %5972 = vmatpush3.bf16.msra.mxu1 %v6207_v10  ;;  %v6199_v21 = vld [vmem:[%s6385_s20 + $0x48] sm:$0xff]   ;;  %v6200_v22 = vld [vmem:[%s6385_s20 + $0x50] sm:$0xff]   ;;  %v6201_v23 = vld [vmem:[%s6385_s20 + $0x58] sm:$0xff]  }
  0x16   : > { %5965 = vmatprep.subr.bf16.mxu1 %v6208_v12  ;;  %v6202_v24 = vld [vmem:[%s6385_s20 + $0x60] sm:$0xff]   ;;  %v6203_v25 = vld [vmem:[%s6385_s20 + $0x68] sm:$0xff]   ;;  %v6204_v26 = vld [vmem:[%s6385_s20 + $0x70] sm:$0xff]  }
  0x17   : > { %5440 = vmatpush3.bf16.msra.mxu0 %v6184_v2  ;;  %v6205_v27 = vld [vmem:[%s6385_s20 + $0x78] sm:$0xff]   ;;  %v6214_v33 = vld [vmem:[%s7917_s3 + $0x40] sm:$0xff]   ;;  %v6215_v55 = vld [vmem:[%s7917_s3 + $0x48] sm:$0xff]  }
  0x18   : > { %5441 = vmatprep.subr.bf16.mxu0 %v6185_v3  ;;  %v6213_v32 = vld [vmem:[%s7917_s3 + $0x138] sm:$0xff]   ;;  %v6455_v35 = vld [vmem:[%s7917_s3 + $0x1c0] sm:$0xff]   ;;  %v6216_v1 = vld [vmem:[%s7917_s3 + $0x50] sm:$0xff]  }
  0x19   : > { %5973 = vmatpush3.bf16.msra.mxu1 %v6208_v12  ;;  %v6461_v36 = vld [vmem:[%s7916_s2] ss:$0 sm:$0xff] }
  0x1a   : > { %5966 = vmatprep.subr.bf16.mxu1 %v6209_v14 }
  0x1b   : > { %5442 = vmatpush3.bf16.msra.mxu0 %v6185_v3 }
  0x1c   : > { %5443 = vmatprep.subr.bf16.mxu0 %v6186_v5 }
  0x1d   : > { %5974 = vmatpush3.bf16.msra.mxu1 %v6209_v14 }
  0x1e   : > { %5967 = vmatprep.subr.bf16.mxu1 %v6210_v28 }
  0x1f   : > { %5444 = vmatpush3.bf16.msra.mxu0 %v6186_v5 }
  0x20   : > { %5445 = vmatprep.subr.bf16.mxu0 %v6187_v6 }
  0x21   : > { %5975 = vmatpush3.bf16.msra.mxu1 %v6210_v28 }
  0x22   : > { %5968 = vmatprep.subr.bf16.mxu1 %v6211_v29 }
  0x23   : > { %5446 = vmatpush3.bf16.msra.mxu0 %v6187_v6 }
  0x24   : > { %5447 = vmatprep.subr.bf16.mxu0 %v6188_v7 }
  0x25   : > { %5976 = vmatpush3.bf16.msra.mxu1 %v6211_v29 }
  0x26   : > { %5969 = vmatprep.subr.bf16.mxu1 %v6212_v30 }
  0x27   : > { %5448 = vmatpush3.bf16.msra.mxu0 %v6188_v7 }
  0x28   : > { %5449 = vmatprep.subr.bf16.mxu0 %v6189_v8 }
  0x29   : > { %5977 = vmatpush3.bf16.msra.mxu1 %v6212_v30 }
  0x2a   : > { %5970 = vmatprep.subr.bf16.mxu1 %v6213_v32 }
  0x2b   : > { %5450 = vmatpush3.bf16.msra.mxu0 %v6189_v8 }
  0x2c   : > { %5483 = vmatprep.subr.bf16.mxu0 %v6206_v9 }
  0x2d   : > { %5978 = vmatpush3.bf16.msra.mxu1 %v6213_v32 }
  0x2e   : > { %5452 = vmatmul.mubr.bf16.vlgmr.msra.gmra.mrb[0].mxu0 %v6191_v11  ;;  %5579 = vmatprep.subr.bf16.mxu1 %v6455_v35 }
  0x2f   : > { %5455 = vmatprep.mubr.bf16.mxu0 %v6192_v13  ;;  %5484 = vmatpush3.bf16.msra.mxu0 %v6206_v9  ;;  %v6217_v13 = vld [vmem:[%s7917_s3 + $0x58] sm:$0xff]  }
  0x30   : > { %5485 = vmatprep.subr.bf16.mxu0 %v6207_v10 }
  0x33   : > { %5486 = vmatpush3.bf16.msra.mxu0 %v6207_v10 }
  0x34   : > { %5487 = vmatprep.subr.bf16.mxu0 %v6208_v12 }
  0x36   : > { %5456 = vmatmul.mubr.bf16.gmra.mrb[4].mxu0 %v6193_v15 }
  0x37   : > { %5459 = vmatprep.mubr.bf16.mxu0 %v6194_v16  ;;  %5488 = vmatpush3.bf16.msra.mxu0 %v6208_v12 }
  0x38   : > { %5489 = vmatprep.subr.bf16.mxu0 %v6209_v14 }
  0x3b   : > { %5490 = vmatpush3.bf16.msra.mxu0 %v6209_v14 }
  0x3c   : > { %5491 = vmatprep.subr.bf16.mxu0 %v6210_v28 }
  0x3e   : > { %5460 = vmatmul.mubr.bf16.gmra.mrb[8].mxu0 %v6195_v17 }
  0x3f   : > { %5463 = vmatprep.mubr.bf16.mxu0 %v6196_v18  ;;  %5492 = vmatpush3.bf16.msra.mxu0 %v6210_v28 }
  0x40   : > { %5493 = vmatprep.subr.bf16.mxu0 %v6211_v29 }
  0x43   : > { %5494 = vmatpush3.bf16.msra.mxu0 %v6211_v29 }
  0x44   : > { %5495 = vmatprep.subr.bf16.mxu0 %v6212_v30 }
  0x46   : > { %5464 = vmatmul.mubr.bf16.gmra.mrb[12].mxu0 %v6197_v19 }
  0x47   : > { %5467 = vmatprep.mubr.bf16.mxu0 %v6198_v20  ;;  %5496 = vmatpush3.bf16.msra.mxu0 %v6212_v30 }
  0x48   : > { %5497 = vmatprep.subr.bf16.mxu0 %v6213_v32 }
  0x4b   : > { %5498 = vmatpush3.bf16.msra.mxu0 %v6213_v32 }
  0x4c   : > { %5531 = vmatprep.subr.bf16.mxu0 %v6214_v33 }
  0x4e   : > { %5468 = vmatmul.mubr.bf16.gmra.mrb[16].mxu0 %v6199_v21 }
  0x4f   : > { %5471 = vmatprep.mubr.bf16.mxu0 %v6200_v22 }
  0x56   : > { %5472 = vmatmul.mubr.bf16.gmra.mrb[20].mxu0 %v6201_v23 }
  0x57   : > { %5475 = vmatprep.mubr.bf16.mxu0 %v6202_v24 }
  0x5e   : > { %5476 = vmatmul.mubr.bf16.gmra.mrb[24].mxu0 %v6203_v25 }
  0x5f   : > { %5479 = vmatprep.mubr.bf16.mxu0 %v6204_v26  ;;  %v6218_v26 = vld [vmem:[%s7917_s3 + $0x60] sm:$0xff]  }
  0x66   : > { %5480 = vmatmul.mubr.bf16.gmra.mrb[28].mxu0 %v6205_v27 }
 0x101   : > { %v5453_v37 = vpop.f32.mrb[0].mxu0 }
 0x102   : > { %v580_v38 = vadd.f32 %v5453_v37, %v6461_v36  ;;  %v571_v39 = vpop.f32.mrb[1].mxu0 }
 0x103   : > { %v572_v40 = vadd.f32 %v6461_v36, %v571_v39  ;;  %v5454_v41 = vpop.f32.mrb[2].mxu0 }
 0x104   : > { %v583_v42 = vadd.f32 %v5454_v41, %v6461_v36  ;;  %v574_v43 = vpop.f32.mrb[3].mxu0  ;;  %v700_v45 = vmax.f32 %v580_v38, 0.0 }
 0x105   : > { %v575_v44 = vadd.f32 %v6461_v36, %v574_v43  ;;  %v698_v47 = vmax.f32 %v572_v40, 0.0  ;;  %v6219_v43 = vld [vmem:[%s7917_s3 + $0x68] sm:$0xff]  }
 0x106   : > { %v701_v46 = vmax.f32 %v583_v42, 0.0 }
 0x107   : > { %v699_v48 = vmax.f32 %v575_v44, 0.0 }
 0x108   : > { %v6467_v49 = vpack.c.bf16 %v701_v46, %v700_v45 }
 0x109   : > { %v6469_v50 = vpack.c.bf16 %v699_v48, %v698_v47  ;;  %v5457_v51 = vpop.f32.mrb[4].mxu0 }
 0x10a   : > { %747 = vst [vmem:[#allocation2 + $0x18] sm:$0xff] %v6467_v49  ;;  %v596_v52 = vadd.f32 %v5457_v51, %v6461_v36  ;;  %v587_v53 = vpop.f32.mrb[5].mxu0  ;;  %v1151_v54 = vshrl.u32 %v6467_v49, 16  ;;  %v1154_v0 = vshll.u32 %v6467_v49, 16 }
 0x10b   : > { %746 = vst [vmem:[#allocation2 + $0x10] sm:$0xff] %v6469_v50  ;;  %v588_v56 = vadd.f32 %v6461_v36, %v587_v53  ;;  %v5458_v57 = vpop.f32.mrb[6].mxu0  ;;  %5499 = vmatprep.mubr.bf16.mxu0 %v6469_v50  ;;  %v1146_v58 = vshll.u32 %v6469_v50, 16  ;;  %v1143_v32 = vshrl.u32 %v6469_v50, 16 }
 0x10c   : > { %v599_v59 = vadd.f32 %v5458_v57, %v6461_v36  ;;  %v590_v60 = vpop.f32.mrb[7].mxu0  ;;  %5500 = vmatmul.mubr.bf16.vlgmr.msra.gmra.mrb[32].mxu0 %v6467_v49  ;;  %v704_v62 = vmax.f32 %v596_v52, 0.0  ;;  %v2843_v2 = vrot.slane %v1151_v54, 7 }
 0x10d   : > { %v591_v61 = vadd.f32 %v6461_v36, %v590_v60  ;;  %5532 = vmatpush3.bf16.msra.mxu0 %v6214_v33  ;;  %v702_v3 = vmax.f32 %v588_v56, 0.0  ;;  %v6492_v5 = vrot.slane %v1146_v58, 1  ;;  %v1120_v33 = vld [vmem:[#allocation2 + $0x8] sm:$0x80]  ;;  %v6559_v56 = vrot.slane %v1143_v32, 7 }
 0x10e   : > { %v705_v63 = vmax.f32 %v599_v59, 0.0  ;;  %5533 = vmatprep.subr.bf16.mxu0 %v6215_v55  ;;  %v6498_v7 = vor.u32 %v2843_v2, %v1154_v0  ;;  %v1139_v48 = vshrl.u32 %v1120_v33, 16 }
 0x10f   : > { %v703_v4 = vmax.f32 %v591_v61, 0.0  ;;  %v6510_v14 = vsel %vm1528_vm0, %v2319_v34, %v6492_v5 }
 0x110   : > { %v6494_v6 = vpack.c.bf16 %v705_v63, %v704_v62 }
 0x111   : > { %v6500_v8 = vpack.c.bf16 %v703_v4, %v702_v3  ;;  %v5461_v9 = vpop.f32.mrb[8].mxu0  ;;  %5534 = vmatpush3.bf16.msra.mxu0 %v6215_v55 }
 0x112   : > { %749 = vst [vmem:[#allocation2 + $0x28] sm:$0xff] %v6494_v6  ;;  %v612_v10 = vadd.f32 %v5461_v9, %v6461_v36  ;;  %v603_v11 = vpop.f32.mrb[9].mxu0  ;;  %v1167_v12 = vshrl.u32 %v6494_v6, 16  ;;  %5535 = vmatprep.subr.bf16.mxu0 %v6216_v1  ;;  %v1170_v29 = vshll.u32 %v6494_v6, 16  ;;  %v1141_v9 = vrot.slane %v1139_v48, 7 }
 0x113   : > { %748 = vst [vmem:[#allocation2 + $0x20] sm:$0xff] %v6500_v8  ;;  %v604_v15 = vadd.f32 %v6461_v36, %v603_v11  ;;  %v5462_v16 = vpop.f32.mrb[10].mxu0  ;;  %5503 = vmatprep.mubr.bf16.mxu0 %v6500_v8  ;;  %v1159_v17 = vshrl.u32 %v6500_v8, 16  ;;  %v1162_v25 = vshll.u32 %v6500_v8, 16  ;;  %v6580_v11 = vor.u32 %v1146_v58, %v6559_v56 }
 0x114   : > { %v615_v18 = vadd.f32 %v5462_v16, %v6461_v36  ;;  %v606_v19 = vpop.f32.mrb[11].mxu0  ;;  %5504 = vmatmul.mubr.bf16.gmra.mrb[36].mxu0 %v6494_v6  ;;  %v6523_v22 = vrot.slane %v1167_v12, 7  ;;  %v708_v23 = vmax.f32 %v612_v10, 0.0 }
 0x115   : > { %v607_v20 = vadd.f32 %v6461_v36, %v606_v19  ;;  %5536 = vmatpush3.bf16.msra.mxu0 %v6216_v1  ;;  %v1161_v21 = vrot.slane %v1159_v17, 7  ;;  %v706_v27 = vmax.f32 %v604_v15, 0.0  ;;  %v6220_v1 = vld [vmem:[%s7917_s3 + $0x70] sm:$0xff]   ;;  %v2323_v19 = vor.u32 %v6492_v5, %v1143_v32 }
 0x116   : > { %v709_v24 = vmax.f32 %v615_v18, 0.0  ;;  %5537 = vmatprep.subr.bf16.mxu0 %v6217_v13  ;;  %v2850_v39 = vor.u32 %v1170_v29, %v6523_v22  ;;  %v1149_v33 = vsel %vm1137_vm1, %v1141_v9, %v6580_v11  ;;  %v6223_v9 = vld [vmem:[%s7917_s3 + $0x1c8] sm:$0xff]  }
 0x117   : > { %v707_v28 = vmax.f32 %v607_v20, 0.0  ;;  %v2847_v34 = vor.u32 %v1162_v25, %v1161_v21  ;;  %v2324_v20 = vrot.slane %v1154_v0, 1 }
 0x118   : > { %v6530_v30 = vpack.c.bf16 %v709_v24, %v708_v23  ;;  %v6554_v51 = vsel %vm1137_vm1, %v1161_v21, %v2850_v39  ;;  %v6221_v23 = vld [vmem:[%s7917_s3 + $0x78] sm:$0xff]  }
 0x119   : > { %v6535_v37 = vpack.c.bf16 %v707_v28, %v706_v27  ;;  %v5465_v38 = vpop.f32.mrb[12].mxu0  ;;  %5538 = vmatpush3.bf16.msra.mxu0 %v6217_v13  ;;  %v6547_v44 = vsel %vm1137_vm1, %v2843_v2, %v2847_v34  ;;  %v6607_v27 = vsel %vm1528_vm0, %v2323_v19, %v2324_v20  ;;  %v6656_v19 = vsel %vm1137_vm1, %v6559_v56, %v6498_v7 }
 0x11a   : > { %751 = vst [vmem:[#allocation2 + $0x38] sm:$0xff] %v6530_v30  ;;  %v628_v40 = vadd.f32 %v5465_v38, %v6461_v36  ;;  %v619_v41 = vpop.f32.mrb[13].mxu0  ;;  %v1183_v42 = vshrl.u32 %v6530_v30, 16  ;;  %5539 = vmatprep.subr.bf16.mxu0 %v6218_v26  ;;  %v1186_v55 = vshll.u32 %v6530_v30, 16 }
 0x11b   : > { %750 = vst [vmem:[#allocation2 + $0x30] sm:$0xff] %v6535_v37  ;;  %v620_v45 = vadd.f32 %v6461_v36, %v619_v41  ;;  %v5466_v46 = vpop.f32.mrb[14].mxu0  ;;  %5507 = vmatprep.mubr.bf16.mxu0 %v6535_v37  ;;  %v1175_v47 = vshrl.u32 %v6535_v37, 16  ;;  %v1178_v63 = vshll.u32 %v6535_v37, 16 }
 0x11c   : > { %v631_v52 = vadd.f32 %v5466_v46, %v6461_v36  ;;  %v622_v53 = vpop.f32.mrb[15].mxu0  ;;  %5508 = vmatmul.mubr.bf16.gmra.mrb[40].mxu0 %v6530_v30  ;;  %v6563_v57 = vrot.slane %v1183_v42, 7  ;;  %v712_v61 = vmax.f32 %v628_v40, 0.0 }
 0x11d   : > { %v623_v59 = vadd.f32 %v6461_v36, %v622_v53  ;;  %5540 = vmatpush3.bf16.msra.mxu0 %v6218_v26  ;;  %v1177_v60 = vrot.slane %v1175_v47, 7  ;;  %v710_v3 = vmax.f32 %v620_v45, 0.0  ;;  %v6231_v45 = vld [vmem:[%s7917_s3] sm:$0xff]  }
 0x11e   : > { %v713_v62 = vmax.f32 %v631_v52, 0.0  ;;  %5541 = vmatprep.subr.bf16.mxu0 %v6219_v43  ;;  %v2856_v2 = vor.u32 %v1186_v55, %v6563_v57 }
 0x11f   : > { %v711_v4 = vmax.f32 %v623_v59, 0.0  ;;  %v2853_v13 = vor.u32 %v1178_v63, %v1177_v60 }
 0x120   : > { %v6575_v10 = vpack.c.bf16 %v713_v62, %v712_v61  ;;  %v6585_v15 = vsel %vm1137_vm1, %v1177_v60, %v2856_v2 }
 0x121   : > { %v6587_v16 = vpack.c.bf16 %v711_v4, %v710_v3  ;;  %v5469_v18 = vpop.f32.mrb[16].mxu0  ;;  %5542 = vmatpush3.bf16.msra.mxu0 %v6219_v43  ;;  %v6600_v24 = vsel %vm1137_vm1, %v6523_v22, %v2853_v13 }
 0x122   : > { %753 = vst [vmem:[#allocation2 + $0x48] sm:$0xff] %v6575_v10  ;;  %v644_v50 = vadd.f32 %v5469_v18, %v6461_v36  ;;  %v635_v58 = vpop.f32.mrb[17].mxu0  ;;  %v1199_v21 = vshrl.u32 %v6575_v10, 16  ;;  %5543 = vmatprep.subr.bf16.mxu0 %v6220_v1  ;;  %v1202_v22 = vshll.u32 %v6575_v10, 16 }
 0x123   : > { %752 = vst [vmem:[#allocation2 + $0x40] sm:$0xff] %v6587_v16  ;;  %v636_v0 = vadd.f32 %v6461_v36, %v635_v58  ;;  %v5470_v5 = vpop.f32.mrb[18].mxu0  ;;  %5511 = vmatprep.mubr.bf16.mxu0 %v6587_v16  ;;  %v1191_v26 = vshrl.u32 %v6587_v16, 16  ;;  %v1194_v43 = vshll.u32 %v6587_v16, 16 }
 0x124   : > { %v647_v28 = vadd.f32 %v5470_v5, %v6461_v36  ;;  %v638_v32 = vpop.f32.mrb[19].mxu0  ;;  %5512 = vmatmul.mubr.bf16.gmra.mrb[44].mxu0 %v6575_v10  ;;  %v6616_v34 = vrot.slane %v1199_v21, 7  ;;  %v716_v40 = vmax.f32 %v644_v50, 0.0  ;;  %v2327_v5 = vrot.slane %v1162_v25, 1  ;;  %v6234_v25 = vld [vmem:[%s7917_s3 + $0x10] sm:$0xff]  }
 0x125   : > { %v639_v38 = vadd.f32 %v6461_v36, %v638_v32  ;;  %5544 = vmatpush3.bf16.msra.mxu0 %v6220_v1  ;;  %5547 = vmatprep.mubr.bf16.mxu0 %v1149_v33  ;;  %v1193_v39 = vrot.slane %v1191_v26, 7  ;;  %v714_v48 = vmax.f32 %v636_v0, 0.0  ;;  %v2326_v1 = vor.u32 %v2324_v20, %v1151_v54  ;;  %v6232_v20 = vld [vmem:[%s7917_s3 + $0x8] sm:$0xff]  }
 0x126   : > { %v717_v41 = vmax.f32 %v647_v28, 0.0  ;;  %5545 = vmatprep.subr.bf16.mxu0 %v6221_v23  ;;  %v2862_v46 = vor.u32 %v1202_v22, %v6616_v34 }
 0x127   : > { %v715_v52 = vmax.f32 %v639_v38, 0.0  ;;  %v2859_v59 = vor.u32 %v1194_v43, %v1193_v39  ;;  %v6224_v38 = vld [vmem:[%s7917_s3 + $0x1d0] sm:$0xff]  }
 0x128   : > { %v6628_v53 = vpack.c.bf16 %v717_v41, %v716_v40  ;;  %v6633_v60 = vsel %vm1137_vm1, %v1193_v39, %v2862_v46 }
 0x129   : > { %v6635_v61 = vpack.c.bf16 %v715_v52, %v714_v48  ;;  %v5473_v62 = vpop.f32.mrb[20].mxu0  ;;  %5546 = vmatpush3.bf16.msra.mxu0 %v6221_v23  ;;  %v6647_v13 = vsel %vm1137_vm1, %v6563_v57, %v2859_v59  ;;  %v6696_v59 = vsel %vm1528_vm0, %v2326_v1, %v2327_v5 }
 0x12a   : > { %755 = vst [vmem:[#allocation2 + $0x58] sm:$0xff] %v6628_v53  ;;  %v660_v2 = vadd.f32 %v5473_v62, %v6461_v36  ;;  %v651_v3 = vpop.f32.mrb[21].mxu0  ;;  %v1215_v4 = vshrl.u32 %v6628_v53, 16  ;;  %5675 = vmatprep.subr.bf16.mxu0 %v6231_v45  ;;  %v1218_v58 = vshll.u32 %v6628_v53, 16 }
 0x12b   : > { %754 = vst [vmem:[#allocation2 + $0x50] sm:$0xff] %v6635_v61  ;;  %v652_v49 = vadd.f32 %v6461_v36, %v651_v3  ;;  %v5474_v54 = vpop.f32.mrb[22].mxu0  ;;  %5515 = vmatprep.mubr.bf16.mxu1 %v6635_v61  ;;  %v1207_v18 = vshrl.u32 %v6635_v61, 16  ;;  %v1210_v33 = vshll.u32 %v6635_v61, 16 }
 0x12c   : > { %v663_v57 = vadd.f32 %v5474_v54, %v6461_v36  ;;  %v654_v50 = vpop.f32.mrb[23].mxu0  ;;  %5516 = vmatmul.mubr.bf16.vlgmr.msra.gmra.mrb[0].mxu1 %v6628_v53  ;;  %5548 = vmatmul.mubr.bf16.vlgmr.msra.gmra.mrb[48].mxu0 %v6656_v19  ;;  %v6667_v23 = vrot.slane %v1215_v4, 7  ;;  %v720_v28 = vmax.f32 %v660_v2, 0.0 }
 0x12d   : > { %v655_v56 = vadd.f32 %v6461_v36, %v654_v50  ;;  %5580 = vmatpush3.bf16.msra.mxu1 %v6455_v35  ;;  %5551 = vmatprep.mubr.bf16.mxu0 %v6547_v44  ;;  %v1209_v0 = vrot.slane %v1207_v18, 7  ;;  %v718_v39 = vmax.f32 %v652_v49, 0.0  ;;  %v6225_v49 = vld [vmem:[%s7917_s3 + $0x1d8] sm:$0xff]  }
 0x12e   : > { %v721_v32 = vmax.f32 %v663_v57, 0.0  ;;  %5581 = vmatprep.subr.bf16.mxu1 %v6223_v9  ;;  %5676 = vmatpush3.bf16.msra.mxu0 %v6231_v45  ;;  %v2868_v35 = vor.u32 %v1218_v58, %v6667_v23  ;;  %v6235_v50 = vld [vmem:[%s7917_s3 + $0x18] sm:$0xff]  }
 0x12f   : > { %v719_v40 = vmax.f32 %v655_v56, 0.0  ;;  %5677 = vmatprep.subr.bf16.mxu0 %v6232_v20  ;;  %v2865_v46 = vor.u32 %v1210_v33, %v1209_v0 }
 0x130   : > { %v6686_v41 = vpack.c.bf16 %v721_v32, %v720_v28  ;;  %v6691_v48 = vsel %vm1137_vm1, %v1209_v0, %v2868_v35 }
 0x131   : > { %v6693_v45 = vpack.c.bf16 %v719_v40, %v718_v39  ;;  %v5477_v52 = vpop.f32.mrb[24].mxu0  ;;  %5582 = vmatpush3.bf16.msra.mxu1 %v6223_v9  ;;  %v6706_v54 = vsel %vm1137_vm1, %v6616_v34, %v2865_v46  ;;  %v6226_v39 = vld [vmem:[%s7917_s3 + $0x1e0] sm:$0xff]  }
 0x132   : > { %757 = vst [vmem:[#allocation2 + $0x68] sm:$0xff] %v6686_v41  ;;  %v676_v62 = vadd.f32 %v5477_v52, %v6461_v36  ;;  %v667_v2 = vpop.f32.mrb[25].mxu0  ;;  %5583 = vmatprep.subr.bf16.mxu1 %v6224_v38  ;;  %v7925_v3 = vshrl.u32 %v6686_v41, 16  ;;  %5678 = vmatpush3.bf16.msra.mxu0 %v6232_v20  ;;  %v2329_v20 = vor.u32 %v2327_v5, %v1159_v17  ;;  %v1234_v0 = vshll.u32 %v6686_v41, 16  ;;  %v6237_v52 = vld [vmem:[%s7917_s3 + $0x20] sm:$0xff]  }
 0x133   : > { %756 = vst [vmem:[#allocation2 + $0x60] sm:$0xff] %v6693_v45  ;;  %v668_v1 = vadd.f32 %v6461_v36, %v667_v2  ;;  %v5478_v9 = vpop.f32.mrb[26].mxu0  ;;  %5519 = vmatprep.mubr.bf16.mxu1 %v6693_v45  ;;  %v7928_v57 = vshrl.u32 %v6693_v45, 16  ;;  %5679 = vmatprep.subr.bf16.mxu0 %v6234_v25  ;;  %v1226_v35 = vshll.u32 %v6693_v45, 16 }
 0x134   : > { %v679_v34 = vadd.f32 %v5478_v9, %v6461_v36  ;;  %v670_v56 = vpop.f32.mrb[27].mxu0  ;;  %5520 = vmatmul.mubr.bf16.gmra.mrb[4].mxu1 %v6686_v41  ;;  %5552 = vmatmul.mubr.bf16.gmra.mrb[52].mxu0 %v6554_v51  ;;  %v6723_v28 = vrot.slane %v7925_v3, 7  ;;  %v724_v17 = vmax.f32 %v676_v62, 0.0  ;;  %v2354_v10 = vrot.slane %v1234_v0, 1 }
 0x135   : > { %v671_v32 = vadd.f32 %v6461_v36, %v670_v56  ;;  %5584 = vmatpush3.bf16.msra.mxu1 %v6224_v38  ;;  %5555 = vmatprep.mubr.bf16.mxu0 %v6600_v24  ;;  %v1225_v8 = vrot.slane %v7928_v57, 7  ;;  %v722_v38 = vmax.f32 %v668_v1, 0.0  ;;  %v2330_v1 = vrot.slane %v1170_v29, 1 }
 0x136   : > { %v725_v5 = vmax.f32 %v679_v34, 0.0  ;;  %5585 = vmatprep.subr.bf16.mxu1 %v6225_v49  ;;  %5680 = vmatpush3.bf16.msra.mxu0 %v6234_v25  ;;  %v2874_v40 = vor.u32 %v1234_v0, %v6723_v28 }
 0x137   : > { %v723_v46 = vmax.f32 %v671_v32, 0.0  ;;  %5681 = vmatprep.subr.bf16.mxu0 %v6235_v50  ;;  %v2871_v2 = vor.u32 %v1226_v35, %v1225_v8 }
 0x138   : > { %v6739_v62 = vpack.c.bf16 %v725_v5, %v724_v17  ;;  %v6744_v9 = vsel %vm1137_vm1, %v1225_v8, %v2874_v40  ;;  %v6227_v8 = vld [vmem:[%s7917_s3 + $0x1e8] sm:$0xff]  }
 0x139   : > { %v6746_v25 = vpack.c.bf16 %v723_v46, %v722_v38  ;;  %v5481_v34 = vpop.f32.mrb[28].mxu0  ;;  %5586 = vmatpush3.bf16.msra.mxu1 %v6225_v49  ;;  %v6758_v5 = vsel %vm1137_vm1, %v6667_v23, %v2871_v2  ;;  %v6238_v38 = vld [vmem:[%s7917_s3 + $0x28] sm:$0xff]  }
 0x13a   : > { %759 = vst [vmem:[#allocation2 + $0x78] sm:$0xff] %v6739_v62  ;;  %v692_v56 = vadd.f32 %v5481_v34, %v6461_v36  ;;  %v683_v32 = vpop.f32.mrb[29].mxu0  ;;  %5587 = vmatprep.subr.bf16.mxu1 %v6226_v39  ;;  %v7926_v17 = vshrl.u32 %v6739_v62, 16  ;;  %5682 = vmatpush3.bf16.msra.mxu0 %v6235_v50  ;;  %v6768_v50 = vsel %vm1528_vm0, %v2329_v20, %v2330_v1  ;;  %v762_v20 = vld [vmem:[%s7921_s7] sm:$0xff] }
 0x13b   : > { %758 = vst [vmem:[#allocation2 + $0x70] sm:$0xff] %v6746_v25  ;;  %v684_v29 = vadd.f32 %v6461_v36, %v683_v32  ;;  %v5482_v49 = vpop.f32.mrb[30].mxu0  ;;  %5523 = vmatprep.mubr.bf16.mxu1 %v6746_v25  ;;  %v7927_v40 = vshrl.u32 %v6746_v25, 16  ;;  %5683 = vmatprep.subr.bf16.mxu0 %v6237_v52  ;;  %v1242_v3 = vshll.u32 %v6746_v25, 16 }
 0x13c   : > { %v695_v23 = vadd.f32 %v5482_v49, %v6461_v36  ;;  %v686_v46 = vpop.f32.mrb[31].mxu0  ;;  %5524 = vmatmul.mubr.bf16.gmra.mrb[8].mxu1 %v6739_v62  ;;  %5556 = vmatmul.mubr.bf16.gmra.mrb[56].mxu0 %v6585_v15  ;;  %v6779_v32 = vrot.slane %v7926_v17, 7  ;;  %v728_v49 = vmax.f32 %v692_v56, 0.0  ;;  %v6240_v56 = vld [vmem:[%s7917_s3 + $0x30] sm:$0xff]  }
 0x13d   : > { %v687_v2 = vadd.f32 %v6461_v36, %v686_v46  ;;  %5588 = vmatpush3.bf16.msra.mxu1 %v6226_v39  ;;  %5559 = vmatprep.mubr.bf16.mxu0 %v6647_v13  ;;  %v1241_v34 = vrot.slane %v7927_v40, 7  ;;  %v6228_v36 = vld [vmem:[%s7917_s3 + $0x1f0] sm:$0xff]   ;;  %v2332_v39 = vor.u32 %v2330_v1, %v1167_v12  ;;  %v726_v46 = vmax.f32 %v684_v29, 0.0 }
 0x13e   : > { %v729_v31 = vmax.f32 %v695_v23, 0.0  ;;  %5589 = vmatprep.subr.bf16.mxu1 %v6227_v8  ;;  %5684 = vmatpush3.bf16.msra.mxu0 %v6237_v52  ;;  %v1250_v40 = vshll.u32 %v6739_v62, 16  ;;  %v2333_v52 = vrot.slane %v1178_v63, 1  ;;  %v2357_v0 = vrot.slane %v1242_v3, 1 }
 0x13f   : > { %v727_v17 = vmax.f32 %v687_v2, 0.0  ;;  %5685 = vmatprep.subr.bf16.mxu0 %v6238_v38  ;;  %3609 = vperm.xlu0 %6180, %v762_v20   ;;  %v2877_v57 = vor.u32 %v1242_v3, %v1241_v34  ;;  %v6230_v20 = vld [vmem:[%s7917_s3 + $0xc0] sm:$0xff]   ;;  %v795_v3 = vld [vmem:[%s7922_s8 + $0x8] sm:$0xff] }
 0x140   : > { %v6794_v23 = vpack.c.bf16 %v729_v31, %v728_v49  ;;  %v2880_v12 = vor.u32 %v1250_v40, %v6779_v32  ;;  %v6229_v31 = vld [vmem:[%s7917_s3 + $0x1f8] sm:$0xff]  }
 0x141   : > { %v6800_v6 = vpack.c.bf16 %v727_v17, %v726_v46  ;;  %5590 = vmatpush3.bf16.msra.mxu1 %v6227_v8  ;;  %v6812_v63 = vsel %vm1137_vm1, %v6723_v28, %v2877_v57  ;;  %v6815_v17 = vsel %vm1528_vm0, %v2332_v39, %v2333_v52  ;;  %v6241_v57 = vld [vmem:[%s7917_s3 + $0x38] sm:$0xff]   ;;  %v2336_v28 = vrot.slane %v1186_v55, 1 }
 0x142   : > { %761 = vst [vmem:[#allocation2 + $0x88] sm:$0xff] %v6794_v23  ;;  %5591 = vmatprep.subr.bf16.mxu1 %v6228_v36  ;;  %v1263_v1 = vshrl.u32 %v6794_v23, 16  ;;  %5686 = vmatpush3.bf16.msra.mxu0 %v6238_v38  ;;  %v6821_v29 = vsel %vm1137_vm1, %v1241_v34, %v2880_v12  ;;  %v2335_v38 = vor.u32 %v2333_v52, %v1175_v47  ;;  %v764_v47 = vld [vmem:[%s7921_s7 + $0x10] sm:$0xff]  ;;  %v763_v34 = vld [vmem:[%s7921_s7 + $0x8] sm:$0xff]  ;;  %v2342_v39 = vrot.slane %v1202_v22, 1  ;;  %v765_v12 = vld [vmem:[%s7921_s7 + $0x18] sm:$0xff] }
 0x143   : > { %760 = vst [vmem:[#allocation2 + $0x80] sm:$0xff] %v6800_v6  ;;  %5527 = vmatprep.mubr.bf16.mxu1 %v6800_v6  ;;  %v1255_v8 = vshrl.u32 %v6800_v6, 16  ;;  %5687 = vmatprep.subr.bf16.mxu0 %v6240_v56  ;;  %v1258_v55 = vshll.u32 %v6800_v6, 16  ;;  %v1266_v46 = vshll.u32 %v6794_v23, 16  ;;  %v2345_v52 = vrot.slane %v1210_v33, 1 }
 0x144   : > { %5528 = vmatmul.mubr.bf16.gmra.mrb[12].mxu1 %v6794_v23  ;;  %5560 = vmatmul.mubr.bf16.gmra.mrb[60].mxu0 %v6633_v60  ;;  %v6834_v2 = vrot.slane %v1263_v1, 7  ;;  %v6851_v49 = vsel %vm1528_vm0, %v2335_v38, %v2336_v28  ;;  %v2338_v22 = vor.u32 %v2336_v28, %v1183_v42  ;;  %v2351_v33 = vrot.slane %v1226_v35, 1 }
 0x145   : > { %5592 = vmatpush3.bf16.msra.mxu1 %v6228_v36  ;;  %5563 = vmatprep.mubr.bf16.mxu0 %v6706_v54  ;;  %v1257_v37 = vrot.slane %v1255_v8, 7  ;;  %v2339_v36 = vrot.slane %v1194_v43, 1  ;;  %v2348_v43 = vrot.slane %v1218_v58, 1  ;;  %v2344_v42 = vor.u32 %v2342_v39, %v1199_v21  ;;  %v6886_v58 = vld [vmem:[%s7917_s3 + $0x80] sm:$0xff]  }
 0x146   : > { %5595 = vmatprep.mubr.bf16.mxu1 %v6607_v27  ;;  %5593 = vmatprep.subr.bf16.mxu1 %v6229_v31  ;;  %v2347_v16 = vor.u32 %v2345_v52, %v1207_v18  ;;  %v794_v21 = vld [vmem:[%s7922_s8] sm:$0xff]  ;;  %v7929_v28 = vshrl.u32 %v6693_v45, 16 }
 0x147   : > { %5688 = vmatpush3.bf16.msra.mxu0 %v6240_v56  ;;  %3619 = vperm.xlu1 %6181, %v764_v47   ;;  %v2883_v38 = vor.u32 %v1258_v55, %v1257_v37  ;;  %v2886_v56 = vor.u32 %v1266_v46, %v6834_v2  ;;  %v6233_v47 = vld [vmem:[%s7917_s3 + $0xc8] sm:$0xff]   ;;  %v2341_v30 = vor.u32 %v2339_v36, %v1191_v26 }
 0x148   : > { %5689 = vmatprep.subr.bf16.mxu0 %v6241_v57  ;;  %3614 = vperm.xlu0 %6180, %v763_v34   ;;  %v6889_v35 = vsel %vm1528_vm0, %v2338_v22, %v2339_v36  ;;  %v2350_v18 = vor.u32 %v2348_v43, %v1215_v4  ;;  %v7930_v36 = vshrl.u32 %v6686_v41, 16  ;;  %v6236_v4 = vld [vmem:[%s7917_s3 + $0xd0] sm:$0xff]  }
 0x149   : > { %5594 = vmatpush3.bf16.msra.mxu1 %v6229_v31  ;;  %v6877_v34 = vsel %vm1137_vm1, %v6779_v32, %v2883_v38  ;;  %v6892_v31 = vsel %vm1137_vm1, %v1257_v37, %v2886_v56  ;;  %v6904_v26 = vsel %vm1528_vm0, %v2341_v30, %v2342_v39  ;;  %v6907_v32 = vsel %vm1528_vm0, %v2344_v42, %v2345_v52 }
 0x14a   : > { %5627 = vmatprep.subr.bf16.mxu1 %v6230_v20  ;;  %v2353_v37 = vor.u32 %v2351_v33, %v7929_v28  ;;  %v2356_v39 = vor.u32 %v2354_v10, %v7930_v36  ;;  %v2360_v52 = vrot.slane %v1250_v40, 1  ;;  %v7932_v56 = vshrl.u32 %v6739_v62, 16  ;;  %v768_v28 = vld [vmem:[%s7921_s7 + $0x30] sm:$0xff]  ;;  %v6243_v36 = vld [vmem:[%s7917_s3 + $0xe8] sm:$0xff]  }
 0x14b   : > { %5690 = vmatpush3.bf16.msra.mxu0 %v6241_v57  ;;  %3624 = vperm.xlu1 %6181, %v765_v12   ;;  %v6915_v57 = vsel %vm1528_vm0, %v2347_v16, %v2348_v43  ;;  %v7931_v12 = vshrl.u32 %v6746_v25, 16  ;;  %v2363_v43 = vrot.slane %v1258_v55, 1 }
 0x14c   : > { %5564 = vmatmul.mubr.bf16.gmra.mrb[64].mxu0 %v6691_v48  ;;  %5596 = vmatmul.mubr.bf16.vlgmr.msra.gmra.mrb[16].mxu1 %v6696_v59  ;;  %v6937_v40 = vsel %vm1528_vm0, %v2353_v37, %v2354_v10  ;;  %v6940_v22 = vsel %vm1528_vm0, %v2356_v39, %v2357_v0  ;;  %v2362_v30 = vor.u32 %v2360_v52, %v7932_v56  ;;  %v6239_v10 = vld [vmem:[%s7917_s3 + $0xd8] sm:$0xff]   ;;  %v800_v56 = vld [vmem:[%s7922_s8 + $0x30] sm:$0xff] }
 0x14d   : > { %5628 = vmatpush3.bf16.msra.mxu1 %v6230_v20  ;;  %5567 = vmatprep.mubr.bf16.mxu0 %v6758_v5  ;;  %v6931_v20 = vsel %vm1528_vm0, %v2350_v18, %v2351_v33  ;;  %v2359_v38 = vor.u32 %v2357_v0, %v7931_v12  ;;  %v796_v33 = vld [vmem:[%s7922_s8 + $0x10] sm:$0xff]  ;;  %v6952_v55 = vor.u32 %v2363_v43, %v1255_v8  ;;  %v766_v8 = vld [vmem:[%s7921_s7 + $0x20] sm:$0xff]  ;;  %v767_v0 = vld [vmem:[%s7921_s7 + $0x28] sm:$0xff] }
 0x14e   : > { %5599 = vmatprep.mubr.bf16.mxu1 %v6768_v50  ;;  %5629 = vmatprep.subr.bf16.mxu1 %v6233_v47  ;;  %v6955_v16 = vsel %vm1528_vm0, %v2362_v30, %v2363_v43  ;;  %v859_v18 = vld [vmem:[#allocation2] sm:$0x80]  ;;  %v769_v39 = vld [vmem:[%s7921_s7 + $0x38] sm:$0xff]  ;;  %v799_v43 = vld [vmem:[%s7922_s8 + $0x28] sm:$0xff] }
 0x14f   : > { %5819 = vmatprep.subr.bf16.mxu0 %v6886_v58  ;;  %3833 = vperm.xlu0 %6180, %v794_v21   ;;  %v6948_v42 = vsel %vm1528_vm0, %v2359_v38, %v2360_v52  ;;  %v797_v21 = vld [vmem:[%s7922_s8 + $0x18] sm:$0xff]  ;;  %v2096_v37 = vshrl.u32 %v859_v18, 16  ;;  %v798_v52 = vld [vmem:[%s7922_s8 + $0x20] sm:$0xff]  ;;  %v6244_v38 = vld [vmem:[%s7917_s3 + $0xf0] sm:$0xff]  }
 0x150   : > { %3838 = vperm.xlu1 %6181, %v795_v3   ;;  %v7933_v3 = vmov 0   ;;  %v772_v18 = vld [vmem:[%s7921_s7 + $0x50] sm:$0xff] }
 0x151   : > { %5630 = vmatpush3.bf16.msra.mxu1 %v6233_v47  ;;  %v6242_v47 = vld [vmem:[%s7917_s3 + $0xe0] sm:$0xff]   ;;  %v6993_v12 = vrot.slane %v7933_v3, 7 }
 0x152   : > { %5631 = vmatprep.subr.bf16.mxu1 %v6236_v4  ;;  %v6253_v3 = vld [vmem:[%s7917_s3 + $0xa0] sm:$0xff]  }
 0x153   : > { %3843 = vperm.xlu0 %6180, %v796_v33   ;;  %v6245_v33 = vld [vmem:[%s7917_s3 + $0xf8] sm:$0xff]  }
 0x154   : > { %5568 = vmatmul.mubr.bf16.gmra.mrb[68].mxu0 %v6744_v9  ;;  %5600 = vmatmul.mubr.bf16.gmra.mrb[20].mxu1 %v6815_v17 }
 0x155   : > { %5571 = vmatprep.mubr.bf16.mxu0 %v6812_v63  ;;  %5603 = vmatprep.mubr.bf16.mxu1 %v6851_v49 }
 0x156   : > { %5632 = vmatpush3.bf16.msra.mxu1 %v6236_v4  ;;  %3848 = vperm.xlu1 %6181, %v797_v21   ;;  %v2098_v4 = vrot.slane %v2096_v37, 7  ;;  %v770_v21 = vld [vmem:[%s7921_s7 + $0x40] sm:$0xff]  ;;  %v773_v37 = vld [vmem:[%s7921_s7 + $0x58] sm:$0xff] }
 0x157   : > { %5633 = vmatprep.subr.bf16.mxu1 %v6239_v10  ;;  %3629 = vperm.xlu0 %6180, %v766_v8   ;;  %v7021_v8 = vld [vmem:[%s7917_s3 + $0x180] sm:$0xff]  }
 0x158   : > { %v2106_v30 = vsel %vm1137_vm1, %v2098_v4, %v6993_v12  ;;  %v774_v4 = vld [vmem:[%s7921_s7 + $0x60] sm:$0xff] }
 0x15a   : > { %5634 = vmatpush3.bf16.msra.mxu1 %v6239_v10  ;;  %3634 = vperm.xlu1 %6181, %v767_v0   ;;  %v801_v10 = vld [vmem:[%s7922_s8 + $0x38] sm:$0xff]  ;;  %v2107_v0 = vsel %vm1137_vm1, %v6993_v12, %v6580_v11  ;;  %v6250_v11 = vld [vmem:[%s7917_s3 + $0x90] sm:$0xff]  }
 0x15b   : > { %5635 = vmatprep.subr.bf16.mxu1 %v6242_v47  ;;  %3639 = vperm.xlu0 %6180, %v768_v28   ;;  %v6248_v28 = vld [vmem:[%s7917_s3 + $0x88] sm:$0xff]  }
 0x15c   : > { %5572 = vmatmul.mubr.bf16.gmra.mrb[72].mxu0 %v6821_v29  ;;  %5604 = vmatmul.mubr.bf16.gmra.mrb[24].mxu1 %v6889_v35 }
 0x15d   : > { %5575 = vmatprep.mubr.bf16.mxu0 %v6877_v34  ;;  %5607 = vmatprep.mubr.bf16.mxu1 %v6904_v26 }
 0x15e   : > { %5636 = vmatpush3.bf16.msra.mxu1 %v6242_v47  ;;  %3644 = vperm.xlu1 %6181, %v769_v39   ;;  %v771_v47 = vld [vmem:[%s7921_s7 + $0x48] sm:$0xff] }
 0x15f   : > { %5637 = vmatprep.subr.bf16.mxu1 %v6243_v36  ;;  %3853 = vperm.xlu0 %6180, %v798_v52   ;;  %v803_v39 = vld [vmem:[%s7922_s8 + $0x48] sm:$0xff]  ;;  %v804_v52 = vld [vmem:[%s7922_s8 + $0x50] sm:$0xff] }
 0x162   : > { %5638 = vmatpush3.bf16.msra.mxu1 %v6243_v36  ;;  %3858 = vperm.xlu1 %6181, %v799_v43   ;;  %v802_v36 = vld [vmem:[%s7922_s8 + $0x40] sm:$0xff]  ;;  %v1511_v43 = vld [vmem:[#allocation2 + $0x90] sm:$0x1] }
 0x163   : > { %5639 = vmatprep.subr.bf16.mxu1 %v6244_v38  ;;  %3863 = vperm.xlu0 %6180, %v800_v56   ;;  %v776_v56 = vld [vmem:[%s7921_s7 + $0x70] sm:$0xff] }
 0x164   : > { %5576 = vmatmul.mubr.bf16.gmra.mrb[76].mxu0 %v6892_v31  ;;  %5608 = vmatmul.mubr.bf16.gmra.mrb[28].mxu1 %v6907_v32 }
 0x165   : > { %5611 = vmatprep.mubr.bf16.mxu1 %v6915_v57  ;;  %5691 = vmatprep.mubr.bf16.mxu0 %v2106_v30  ;;  %v1651_v30 = vrot.slane %v1266_v46, 1 }
 0x166   : > { %5640 = vmatpush3.bf16.msra.mxu1 %v6244_v38  ;;  %3868 = vperm.xlu1 %6181, %v801_v10   ;;  %v775_v38 = vld [vmem:[%s7921_s7 + $0x68] sm:$0xff] }
 0x167   : > { %5641 = vmatprep.subr.bf16.mxu1 %v6245_v33  ;;  %3649 = vperm.xlu0 %6180, %v770_v21   ;;  %v6254_v10 = vld [vmem:[%s7917_s3 + $0xa8] sm:$0xff]   ;;  %v777_v21 = vld [vmem:[%s7921_s7 + $0x78] sm:$0xff]  ;;  %v1652_v46 = vsel %vm1528_vm0, %v6952_v55, %v1651_v30 }
 0x16a   : > { %5642 = vmatpush3.bf16.msra.mxu1 %v6245_v33  ;;  %3654 = vperm.xlu1 %6181, %v771_v47   ;;  %v1657_v33 = vshll.u32 %v1511_v43, 16  ;;  %v806_v47 = vld [vmem:[%s7922_s8 + $0x60] sm:$0xff]  ;;  %v781_v43 = vld [vmem:[%s7921_s7 + $0x98] sm:$0xff] }
 0x16b   : > { %5723 = vmatprep.subr.bf16.mxu1 %v7021_v8  ;;  %3659 = vperm.xlu0 %6180, %v772_v18   ;;  %v1655_v18 = vor.u32 %v1651_v30, %v1263_v1  ;;  %v6257_v1 = vld [vmem:[%s7917_s3 + $0xb8] sm:$0xff]  }
 0x16c   : > { %5612 = vmatmul.mubr.bf16.gmra.mrb[32].mxu1 %v6931_v20  ;;  %5692 = vmatmul.mubr.bf16.vlgmr.msra.gmra.mrb[48].mxu0 %v2107_v0  ;;  %v1659_v0 = vrot.slane %v1657_v33, 1  ;;  %v7136_v30 = vld [vmem:[#allocation2 + $0x18] sm:$0xff]  ;;  %v6252_v33 = vld [vmem:[%s7917_s3 + $0x190] sm:$0xff]  }
 0x16d   : > { %5615 = vmatprep.mubr.bf16.mxu1 %v6937_v40  ;;  %5695 = vmatprep.mubr.bf16.mxu0 %v6656_v19  ;;  %v6251_v19 = vld [vmem:[%s7917_s3 + $0x98] sm:$0xff]  }
 0x16e   : > { %5820 = vmatpush3.bf16.msra.mxu0 %v6886_v58  ;;  %3664 = vperm.xlu1 %6181, %v773_v37   ;;  %v805_v58 = vld [vmem:[%s7922_s8 + $0x58] sm:$0xff]  ;;  %v807_v37 = vld [vmem:[%s7922_s8 + $0x68] sm:$0xff] }
 0x16f   : > { %5821 = vmatprep.subr.bf16.mxu0 %v6248_v28  ;;  %3873 = vperm.xlu0 %6180, %v802_v36   ;;  %v808_v36 = vld [vmem:[%s7922_s8 + $0x70] sm:$0xff] }
 0x172   : > { %5822 = vmatpush3.bf16.msra.mxu0 %v6248_v28  ;;  %3878 = vperm.xlu1 %6181, %v803_v39   ;;  %v6256_v28 = vld [vmem:[%s7917_s3 + $0xb0] sm:$0xff]   ;;  %v809_v39 = vld [vmem:[%s7922_s8 + $0x78] sm:$0xff] }
 0x173   : > { %5823 = vmatprep.subr.bf16.mxu0 %v6250_v11  ;;  %3883 = vperm.xlu0 %6180, %v804_v52   ;;  %v778_v52 = vld [vmem:[%s7921_s7 + $0x80] sm:$0xff] }
 0x174   : > { %5616 = vmatmul.mubr.bf16.gmra.mrb[36].mxu1 %v6940_v22  ;;  %5696 = vmatmul.mubr.bf16.gmra.mrb[52].mxu0 %v6547_v44 }
 0x175   : > { %5619 = vmatprep.mubr.bf16.mxu1 %v6948_v42  ;;  %5699 = vmatprep.mubr.bf16.mxu0 %v6554_v51 }
 0x176   : > { %5824 = vmatpush3.bf16.msra.mxu0 %v6250_v11  ;;  %3888 = vperm.xlu1 %6181, %v805_v58   ;;  %v1660_v11 = vsel %vm1528_vm0, %v1655_v18, %v1659_v0  ;;  %v779_v58 = vld [vmem:[%s7921_s7 + $0x88] sm:$0xff]  ;;  %v782_v0 = vld [vmem:[%s7921_s7 + $0xa0] sm:$0xff] }
 0x177   : > { %5825 = vmatprep.subr.bf16.mxu0 %v6251_v19  ;;  %3669 = vperm.xlu0 %6180, %v774_v4   ;;  %v780_v4 = vld [vmem:[%s7921_s7 + $0x90] sm:$0xff]  ;;  %v7159_v18 = vld [vmem:[#allocation2 + $0x28] sm:$0xff] }
 0x17a   : > { %5826 = vmatpush3.bf16.msra.mxu0 %v6251_v19  ;;  %3674 = vperm.xlu1 %6181, %v775_v38   ;;  %v7116_v19 = vld [vmem:[#allocation2 + $0x8] sm:$0xff]  ;;  %v6287_v38 = vld [vmem:[#allocation2 + $0x10] sm:$0xff] }
 0x17b   : > { %5827 = vmatprep.subr.bf16.mxu0 %v6253_v3  ;;  %3679 = vperm.xlu0 %6180, %v776_v56   ;;  %v810_v56 = vld [vmem:[%s7922_s8 + $0x80] sm:$0xff] }
 0x17c   : > { %5620 = vmatmul.mubr.bf16.gmra.mrb[40].mxu1 %v6955_v16  ;;  %5700 = vmatmul.mubr.bf16.gmra.mrb[56].mxu0 %v6600_v24 }
 0x17d   : > { %5623 = vmatprep.mubr.bf16.mxu1 %v1652_v46  ;;  %5703 = vmatprep.mubr.bf16.mxu0 %v6585_v15  ;;  %v7152_v46 = vld [vmem:[#allocation2 + $0x20] sm:$0xff] }
 0x17e   : > { %5828 = vmatpush3.bf16.msra.mxu0 %v6253_v3  ;;  %3684 = vperm.xlu1 %6181, %v777_v21   ;;  %v6249_v3 = vld [vmem:[%s7917_s3 + $0x188] sm:$0xff]   ;;  %v6255_v21 = vld [vmem:[%s7917_s3 + $0x198] sm:$0xff]  }
 0x17f   : > { %5829 = vmatprep.subr.bf16.mxu0 %v6254_v10  ;;  %3893 = vperm.xlu0 %6180, %v806_v47   ;;  %v813_v47 = vld [vmem:[%s7922_s8 + $0x98] sm:$0xff] }
 0x182   : > { %5830 = vmatpush3.bf16.msra.mxu0 %v6254_v10  ;;  %3898 = vperm.xlu1 %6181, %v807_v37   ;;  %v811_v10 = vld [vmem:[%s7922_s8 + $0x88] sm:$0xff] }
 0x183   : > { %5831 = vmatprep.subr.bf16.mxu0 %v6256_v28  ;;  %3903 = vperm.xlu0 %6180, %v808_v36   ;;  %v783_v37 = vld [vmem:[%s7921_s7 + $0xa8] sm:$0xff]  ;;  %v2822_v36 = vld [vmem:[#allocation2 + $0x10] sm:$0x80] }
 0x184   : > { %5624 = vmatmul.mubr.bf16.gmra.mrb[44].mxu1 %v1660_v11  ;;  %5704 = vmatmul.mubr.bf16.gmra.mrb[60].mxu0 %v6647_v13  ;;  %v6259_v11 = vld [vmem:[%s7917_s3 + $0x1a8] sm:$0xff]  }
 0x185   : > { %5707 = vmatprep.mubr.bf16.mxu0 %v6633_v60  ;;  %5643 = vmatprep.mubr.bf16.mxu1 %v7116_v19 }
 0x186   : > { %5832 = vmatpush3.bf16.msra.mxu0 %v6256_v28  ;;  %3908 = vperm.xlu1 %6181, %v809_v39   ;;  %v6258_v28 = vld [vmem:[%s7917_s3 + $0x1a0] sm:$0xff]   ;;  %v7178_v39 = vld [vmem:[#allocation2 + $0x30] sm:$0xff] }
 0x187   : > { %5833 = vmatprep.subr.bf16.mxu0 %v6257_v1  ;;  %3689 = vperm.xlu0 %6180, %v778_v52   ;;  %v2840_v52 = vshrl.u32 %v2822_v36, 16  ;;  %v788_v36 = vld [vmem:[%s7921_s7 + $0xd0] sm:$0xff] }
 0x18a   : > { %5834 = vmatpush3.bf16.msra.mxu0 %v6257_v1  ;;  %3694 = vperm.xlu1 %6181, %v779_v58   ;;  %v784_v1 = vld [vmem:[%s7921_s7 + $0xb0] sm:$0xff]  ;;  %v785_v58 = vld [vmem:[%s7921_s7 + $0xb8] sm:$0xff] }
 0x18b   : > { %3699 = vperm.xlu0 %6180, %v780_v4   ;;  %v7185_v4 = vld [vmem:[#allocation2 + $0x38] sm:$0xff] }
 0x18c   : > { %5644 = vmatmul.mubr.bf16.vlgmr.msra.gmra.mrb[48].mxu1 %v6287_v38  ;;  %5708 = vmatmul.mubr.bf16.gmra.mrb[64].mxu0 %v6706_v54  ;;  %v814_v38 = vld [vmem:[%s7922_s8 + $0xa0] sm:$0xff] }
 0x18d   : > { %5724 = vmatpush3.bf16.msra.mxu1 %v7021_v8  ;;  %5647 = vmatprep.mubr.bf16.mxu1 %v7136_v30  ;;  %v812_v8 = vld [vmem:[%s7922_s8 + $0x90] sm:$0xff] }
 0x18e   : > { %5711 = vmatprep.mubr.bf16.mxu0 %v6691_v48  ;;  %5725 = vmatprep.subr.bf16.mxu1 %v6249_v3 }
 0x18f   : > { %3704 = vperm.xlu1 %6181, %v781_v43   ;;  %3913 = vperm.xlu0 %6180, %v810_v56   ;;  %v2842_v43 = vrot.slane %v2840_v52, 7  ;;  %v815_v56 = vld [vmem:[%s7922_s8 + $0xa8] sm:$0xff] }
 0x191   : > { %5726 = vmatpush3.bf16.msra.mxu1 %v6249_v3  ;;  %v6260_v3 = vld [vmem:[%s7917_s3 + $0x1b0] sm:$0xff]  }
 0x192   : > { %5727 = vmatprep.subr.bf16.mxu1 %v6252_v33 }
 0x193   : > { %3918 = vperm.xlu1 %6181, %v811_v10   ;;  %3923 = vperm.xlu0 %6180, %v812_v8   ;;  %v816_v10 = vld [vmem:[%s7922_s8 + $0xb0] sm:$0xff]  ;;  %v7204_v8 = vld [vmem:[#allocation2 + $0x40] sm:$0xff] }
 0x194   : > { %5648 = vmatmul.mubr.bf16.gmra.mrb[52].mxu1 %v7152_v46  ;;  %5712 = vmatmul.mubr.bf16.gmra.mrb[68].mxu0 %v6758_v5 }
 0x195   : > { %5651 = vmatprep.mubr.bf16.mxu1 %v7159_v18  ;;  %5715 = vmatprep.mubr.bf16.mxu0 %v6744_v9 }
 0x196   : > { %5728 = vmatpush3.bf16.msra.mxu1 %v6252_v33  ;;  %v6261_v33 = vld [vmem:[%s7917_s3 + $0x1b8] sm:$0xff]  }
 0x197   : > { %5729 = vmatprep.subr.bf16.mxu1 %v6255_v21  ;;  %3928 = vperm.xlu1 %6181, %v813_v47   ;;  %v817_v47 = vld [vmem:[%s7922_s8 + $0xb8] sm:$0xff] }
 0x198   : > { %3709 = vperm.xlu0 %6180, %v782_v0   ;;  %v7213_v0 = vld [vmem:[#allocation2 + $0x48] sm:$0xff] }
 0x19a   : > { %5730 = vmatpush3.bf16.msra.mxu1 %v6255_v21  ;;  %v2845_v21 = vsel %vm1137_vm1, %v2842_v43, %v6498_v7  ;;  %v786_v7 = vld [vmem:[%s7921_s7 + $0xc0] sm:$0xff] }
 0x19b   : > { %5731 = vmatprep.subr.bf16.mxu1 %v6258_v28  ;;  %3714 = vperm.xlu1 %6181, %v783_v37   ;;  %v787_v37 = vld [vmem:[%s7921_s7 + $0xc8] sm:$0xff] }
 0x19c   : > { %5652 = vmatmul.mubr.bf16.gmra.mrb[56].mxu1 %v7178_v39  ;;  %5716 = vmatmul.mubr.bf16.gmra.mrb[72].mxu0 %v6812_v63 }
 0x19d   : > { %5655 = vmatprep.mubr.bf16.mxu1 %v7185_v4  ;;  %5719 = vmatprep.mubr.bf16.mxu0 %v6821_v29 }
 0x19e   : > { %5732 = vmatpush3.bf16.msra.mxu1 %v6258_v28  ;;  %3719 = vperm.xlu0 %6180, %v784_v1   ;;  %v6262_v28 = vld [vmem:[%s7917_s3 + $0x140] sm:$0xff]  }
 0x19f   : > { %5733 = vmatprep.subr.bf16.mxu1 %v6259_v11  ;;  %3724 = vperm.xlu1 %6181, %v785_v58   ;;  %v818_v1 = vld [vmem:[%s7922_s8 + $0xc0] sm:$0xff] }
 0x1a2   : > { %5734 = vmatpush3.bf16.msra.mxu1 %v6259_v11  ;;  %3933 = vperm.xlu0 %6180, %v814_v38   ;;  %v789_v11 = vld [vmem:[%s7921_s7 + $0xd8] sm:$0xff]  ;;  %v876_v38 = vld [vmem:[#allocation2 + $0x88] sm:$0x1] }
 0x1a3   : > { %5735 = vmatprep.subr.bf16.mxu1 %v6260_v3  ;;  %3938 = vperm.xlu1 %6181, %v815_v56   ;;  %v2367_v43 = vshll.u32 %v876_v38, 16 }
 0x1a4   : > { %5656 = vmatmul.mubr.bf16.gmra.mrb[60].mxu1 %v7204_v8  ;;  %5720 = vmatmul.mubr.bf16.gmra.mrb[76].mxu0 %v6877_v34 }
 0x1a5   : > { %5659 = vmatprep.mubr.bf16.mxu1 %v7213_v0  ;;  %5835 = vmatprep.mubr.bf16.mxu0 %v2845_v21  ;;  %v2369_v56 = vrot.slane %v2367_v43, 1  ;;  %v6300_v21 = vld [vmem:[#allocation2 + $0x78] sm:$0xff]  ;;  %v3128_v43 = vld [vmem:[#allocation2 + $0x50] sm:$0xff] }
 0x1a6   : > { %5736 = vmatpush3.bf16.msra.mxu1 %v6260_v3  ;;  %3943 = vperm.xlu0 %6180, %v816_v10   ;;  %v6298_v10 = vld [vmem:[#allocation2 + $0x68] sm:$0xff] }
 0x1a7   : > { %5737 = vmatprep.subr.bf16.mxu1 %v6261_v33  ;;  %3948 = vperm.xlu1 %6181, %v817_v47   ;;  %v3121_v47 = vld [vmem:[#allocation2 + $0x18] sm:$0xff] }
 0x1aa   : > { %5738 = vmatpush3.bf16.msra.mxu1 %v6261_v33  ;;  %3729 = vperm.xlu0 %6180, %v786_v7   ;;  %v6297_v33 = vld [vmem:[#allocation2 + $0x60] sm:$0xff] }
 0x1ab   : > { %5771 = vmatprep.subr.bf16.mxu1 %v6262_v28  ;;  %3734 = vperm.xlu1 %6181, %v787_v37  }
 0x1ac   : > { %5660 = vmatmul.mubr.bf16.gmra.mrb[0].mxu1 %v6635_v61  ;;  %5836 = vmatmul.mubr.bf16.vlgmr.msra.gmra.mrb[48].mxu0 %v6547_v44  ;;  %v819_v61 = vld [vmem:[%s7922_s8 + $0xc8] sm:$0xff]  ;;  %v820_v44 = vld [vmem:[%s7922_s8 + $0xd0] sm:$0xff] }
 0x1ad   : > { %5663 = vmatprep.mubr.bf16.mxu1 %v6628_v53  ;;  %5839 = vmatprep.mubr.bf16.mxu0 %v6554_v51  ;;  %v821_v51 = vld [vmem:[%s7922_s8 + $0xd8] sm:$0xff]  ;;  %v790_v53 = vld [vmem:[%s7921_s7 + $0xe0] sm:$0xff] }
 0x1ae   : > { %3739 = vperm.xlu0 %6180, %v788_v36   ;;  %v3123_v36 = vld [vmem:[#allocation2 + $0x28] sm:$0xff] }
 0x1af   : > { %3744 = vperm.xlu1 %6181, %v789_v11   ;;  %v3155_v11 = vshrl.u32 %v3121_v47, 16 }
 0x1b2   : > { %3953 = vperm.xlu0 %6180, %v818_v1  }
 0x1b3   : > { %3958 = vperm.xlu1 %6181, %v819_v61   ;;  %v3124_v61 = vld [vmem:[#allocation2 + $0x30] sm:$0xff] }
 0x1b4   : > { %5664 = vmatmul.mubr.bf16.gmra.mrb[4].mxu1 %v6693_v45  ;;  %5840 = vmatmul.mubr.bf16.gmra.mrb[52].mxu0 %v6600_v24  ;;  %v791_v45 = vld [vmem:[%s7921_s7 + $0xe8] sm:$0xff]  ;;  %v792_v24 = vld [vmem:[%s7921_s7 + $0xf0] sm:$0xff] }
 0x1b5   : > { %5667 = vmatprep.mubr.bf16.mxu1 %v6686_v41  ;;  %5843 = vmatprep.mubr.bf16.mxu0 %v6585_v15  ;;  %v793_v15 = vld [vmem:[%s7921_s7 + $0xf8] sm:$0xff]  ;;  %v822_v41 = vld [vmem:[%s7922_s8 + $0xe0] sm:$0xff] }
 0x1b6   : > { %3963 = vperm.xlu0 %6180, %v820_v44  }
 0x1b7   : > { %3968 = vperm.xlu1 %6181, %v821_v51   ;;  %v3170_v51 = vshll.u32 %v3123_v36, 16 }
 0x1ba   : > { %3749 = vperm.xlu0 %6180, %v790_v53  }
 0x1bb   : > { %3754 = vperm.xlu1 %6181, %v791_v45   ;;  %v3178_v45 = vshll.u32 %v3124_v61, 16 }
 0x1bc   : > { %5668 = vmatmul.mubr.bf16.gmra.mrb[8].mxu1 %v6746_v25  ;;  %5844 = vmatmul.mubr.bf16.gmra.mrb[56].mxu0 %v6647_v13  ;;  %v6263_v13 = vld [vmem:[%s7917_s3 + $0x148] sm:$0xff]   ;;  %v6268_v25 = vld [vmem:[%s7917_s3 + $0x170] sm:$0xff]  }
 0x1bd   : > { %5671 = vmatprep.mubr.bf16.mxu1 %v6739_v62  ;;  %5847 = vmatprep.mubr.bf16.mxu0 %v6633_v60  ;;  %v6265_v60 = vld [vmem:[%s7917_s3 + $0x158] sm:$0xff]   ;;  %v824_v62 = vld [vmem:[%s7922_s8 + $0xf0] sm:$0xff] }
 0x1be   : > { %3759 = vperm.xlu0 %6180, %v792_v24  }
 0x1bf   : > { %3764 = vperm.xlu1 %6181, %v793_v15   ;;  %v3172_v15 = vrot.slane %v3170_v51, 1 }
 0x1c2   : > { %3973 = vperm.xlu0 %6180, %v822_v41  }
 0x1c4   : > { %5672 = vmatmul.mubr.bf16.gmra.mrb[12].mxu1 %v6800_v6  ;;  %5848 = vmatmul.mubr.bf16.gmra.mrb[60].mxu0 %v6706_v54  ;;  %v825_v54 = vld [vmem:[%s7922_s8 + $0xf8] sm:$0xff] }
 0x1c5   : > { %5739 = vmatprep.mubr.bf16.mxu1 %v6510_v14  ;;  %5851 = vmatprep.mubr.bf16.mxu0 %v6691_v48  ;;  %v6264_v14 = vld [vmem:[%s7917_s3 + $0x150] sm:$0xff]   ;;  %v6266_v48 = vld [vmem:[%s7917_s3 + $0x160] sm:$0xff]  }
 0x1c6   : > { %3983 = vperm.xlu0 %6180, %v824_v62   ;;  %v3182_v62 = vshrl.u32 %v3124_v61, 16  ;;  %v3132_v61 = vld [vmem:[#allocation2 + $0x70] sm:$0xff] }
 0x1cc   : > { %5740 = vmatmul.mubr.bf16.vlgmr.msra.gmra.mrb[16].mxu1 %v6607_v27  ;;  %5852 = vmatmul.mubr.bf16.gmra.mrb[64].mxu0 %v6758_v5  ;;  %v823_v27 = vld [vmem:[%s7922_s8 + $0xe8] sm:$0xff] }
 0x1cd   : > { %5772 = vmatpush3.bf16.msra.mxu1 %v6262_v28  ;;  %5743 = vmatprep.mubr.bf16.mxu1 %v6696_v59  ;;  %v6267_v59 = vld [vmem:[%s7917_s3 + $0x168] sm:$0xff]   ;;  %v3157_v28 = vshll.u32 %v3121_v47, 16 }
 0x1ce   : > { %5855 = vmatprep.mubr.bf16.mxu0 %v6744_v9  ;;  %5773 = vmatprep.subr.bf16.mxu1 %v6263_v13 }
 0x1cf   : > { %3978 = vperm.xlu1 %6181, %v823_v27   ;;  %v3159_v37 = vrot.slane %v3157_v28, 1  ;;  %v3214_v28 = vshrl.u32 %v3128_v43, 16 }
 0x1d1   : > { %5774 = vmatpush3.bf16.msra.mxu1 %v6263_v13  ;;  %v3160_v44 = vor.u32 %v3159_v37, %v3155_v11 }
 0x1d2   : > { %5775 = vmatprep.subr.bf16.mxu1 %v6264_v14 }
 0x1d3   : > { %3988 = vperm.xlu1 %6181, %v825_v54  }
 0x1d4   : > { %5744 = vmatmul.mubr.bf16.gmra.mrb[20].mxu1 %v6768_v50  ;;  %5856 = vmatmul.mubr.bf16.gmra.mrb[68].mxu0 %v6812_v63 }
 0x1d5   : > { %5747 = vmatprep.mubr.bf16.mxu1 %v6815_v17  ;;  %5859 = vmatprep.mubr.bf16.mxu0 %v6821_v29  ;;  %v2895_v17 = vsel %vm1137_vm1, %v6834_v2, %v6993_v12  ;;  %v6269_v29 = vld [vmem:[%s7917_s3 + $0x178] sm:$0xff]  }
 0x1d6   : > { %5776 = vmatpush3.bf16.msra.mxu1 %v6264_v14  ;;  %v3174_v14 = vshrl.u32 %v3123_v36, 16  ;;  %v3131_v36 = vld [vmem:[#allocation2 + $0x68] sm:$0xff] }
 0x1d7   : > { %5777 = vmatprep.subr.bf16.mxu1 %v6265_v60  ;;  %v3234_v51 = vshll.u32 %v3131_v36, 16 }
 0x1d8   : > { %v3176_v27 = vor.u32 %v3174_v14, %v3172_v15  ;;  %v3620_v14 = vpop.permute.xlu1 %3619 }
 0x1da   : > { %5778 = vmatpush3.bf16.msra.mxu1 %v6265_v60  ;;  %v3180_v60 = vrot.slane %v3178_v45, 1 }
 0x1db   : > { %5779 = vmatprep.subr.bf16.mxu1 %v6266_v48 }
 0x1dc   : > { %5748 = vmatmul.mubr.bf16.gmra.mrb[24].mxu1 %v6851_v49  ;;  %5860 = vmatmul.mubr.bf16.gmra.mrb[72].mxu0 %v6877_v34  ;;  %v6270_v34 = vld [vmem:[%s7917_s3 + $0x200] sm:$0xff]  }
 0x1dd   : > { %5751 = vmatprep.mubr.bf16.mxu1 %v6889_v35  ;;  %5863 = vmatprep.mubr.bf16.mxu0 %v6892_v31 }
 0x1de   : > { %5780 = vmatpush3.bf16.msra.mxu1 %v6266_v48 }
 0x1df   : > { %v7310_v9 = vpop.f32.mrb[32].mxu0  ;;  %5781 = vmatprep.subr.bf16.mxu1 %v6267_v59 }
 0x1e0   : > { %v7315_v5 = vpop.f32.mrb[33].mxu0 }
 0x1e1   : > { %v7317_v50 = vpop.f32.mrb[34].mxu0 }
 0x1e2   : > { %v7319_v63 = vpop.f32.mrb[35].mxu0  ;;  %5782 = vmatpush3.bf16.msra.mxu1 %v6267_v59  ;;  %v3181_v59 = vsel %vm1528_vm0, %v3176_v27, %v3180_v60  ;;  %v3238_v27 = vshrl.u32 %v3131_v36, 16 }
 0x1e3   : > { %5783 = vmatprep.subr.bf16.mxu1 %v6268_v25 }
 0x1e4   : > { %5752 = vmatmul.mubr.bf16.gmra.mrb[28].mxu1 %v6904_v26  ;;  %5864 = vmatmul.mubr.bf16.gmra.mrb[76].mxu0 %v2895_v17  ;;  %v3184_v17 = vor.u32 %v3182_v62, %v3180_v60 }
 0x1e5   : > { %5755 = vmatprep.mubr.bf16.mxu1 %v6907_v32 }
 0x1e6   : > { %5784 = vmatpush3.bf16.msra.mxu1 %v6268_v25 }
 0x1e7   : > { %v7329_v49 = vpop.f32.mrb[36].mxu0  ;;  %5785 = vmatprep.subr.bf16.mxu1 %v6269_v29 }
 0x1e8   : > { %v7334_v35 = vpop.f32.mrb[37].mxu0 }
 0x1e9   : > { %v7336_v2 = vpop.f32.mrb[38].mxu0 }
 0x1ea   : > { %v7338_v31 = vpop.f32.mrb[39].mxu0  ;;  %5786 = vmatpush3.bf16.msra.mxu1 %v6269_v29  ;;  %v3127_v29 = vld [vmem:[#allocation2 + $0x48] sm:$0xff] }
 0x1eb   : > { %5867 = vmatprep.subr.bf16.mxu1 %v6270_v34 }
 0x1ec   : > { %5756 = vmatmul.mubr.bf16.gmra.mrb[32].mxu1 %v6915_v57 }
 0x1ed   : > { %5759 = vmatprep.mubr.bf16.mxu1 %v6931_v20 }
 0x1ef   : > { %v7342_v26 = vpop.f32.mrb[40].mxu0 }
 0x1f0   : > { %v7344_v32 = vpop.f32.mrb[41].mxu0 }
 0x1f1   : > { %v7346_v12 = vpop.f32.mrb[42].mxu0 }
 0x1f2   : > { %v7348_v52 = vpop.f32.mrb[43].mxu0 }
 0x1f4   : > { %5760 = vmatmul.mubr.bf16.gmra.mrb[36].mxu1 %v6937_v40  ;;  %v2370_v40 = vsel %vm1528_vm0, %v6952_v55, %v2369_v56  ;;  %v6273_v55 = vld [vmem:[%s7917_s3 + $0x218] sm:$0xff]  }
 0x1f5   : > { %5763 = vmatprep.mubr.bf16.mxu1 %v6940_v22  ;;  %v6271_v22 = vld [vmem:[%s7917_s3 + $0x208] sm:$0xff]  }
 0x1f7   : > { %v7352_v58 = vpop.f32.mrb[44].mxu0 }
 0x1f8   : > { %v7354_v3 = vpop.f32.mrb[45].mxu0 }
 0x1f9   : > { %v7356_v57 = vpop.f32.mrb[46].mxu0 }
 0x1fa   : > { %v7358_v20 = vpop.f32.mrb[47].mxu0 }
 0x1fc   : > { %5764 = vmatmul.mubr.bf16.gmra.mrb[40].mxu1 %v6948_v42  ;;  %v6272_v42 = vld [vmem:[%s7917_s3 + $0x210] sm:$0xff]  }
 0x1fd   : > { %5767 = vmatprep.mubr.bf16.mxu1 %v6955_v16  ;;  %v6274_v16 = vld [vmem:[%s7917_s3 + $0x220] sm:$0xff]  }
 0x204   : > { %5768 = vmatmul.mubr.bf16.gmra.mrb[44].mxu1 %v2370_v40  ;;  %v3202_v40 = vshll.u32 %v3127_v29, 16 }
 0x205   : > { %5787 = vmatprep.mubr.bf16.mxu1 %v7136_v30  ;;  %v6275_v30 = vld [vmem:[%s7917_s3 + $0x228] sm:$0xff]  }
 0x20c   : > { %5788 = vmatmul.mubr.bf16.vlgmr.msra.gmra.mrb[48].mxu1 %v7152_v46  ;;  %v6276_v46 = vld [vmem:[%s7917_s3 + $0x230] sm:$0xff]  }
 0x20d   : > { %5868 = vmatpush3.bf16.msra.mxu1 %v6270_v34  ;;  %5791 = vmatprep.mubr.bf16.mxu1 %v7159_v18  ;;  %v6277_v18 = vld [vmem:[%s7917_s3 + $0x238] sm:$0xff]  }
 0x20e   : > { %5869 = vmatprep.subr.bf16.mxu1 %v6271_v22 }
 0x211   : > { %5870 = vmatpush3.bf16.msra.mxu1 %v6271_v22 }
 0x212   : > { %5871 = vmatprep.subr.bf16.mxu1 %v6272_v42 }
 0x214   : > { %5792 = vmatmul.mubr.bf16.gmra.mrb[52].mxu1 %v7178_v39  ;;  %v6295_v39 = vld [vmem:[#allocation2 + $0x50] sm:$0xff] }
 0x215   : > { %5795 = vmatprep.mubr.bf16.mxu1 %v7185_v4  ;;  %5872 = vmatpush3.bf16.msra.mxu1 %v6272_v42  ;;  %v6296_v4 = vld [vmem:[#allocation2 + $0x58] sm:$0xff] }
 0x216   : > { %5873 = vmatprep.subr.bf16.mxu1 %v6273_v55 }
 0x219   : > { %5874 = vmatpush3.bf16.msra.mxu1 %v6273_v55  ;;  %v3210_v55 = vshll.u32 %v3128_v43, 16  ;;  %v3135_v43 = vld [vmem:[#allocation2 + $0x88] sm:$0xff] }
 0x21a   : > { %5875 = vmatprep.subr.bf16.mxu1 %v6274_v16 }
 0x21c   : > { %5796 = vmatmul.mubr.bf16.gmra.mrb[56].mxu1 %v7204_v8  ;;  %v6299_v8 = vld [vmem:[#allocation2 + $0x70] sm:$0xff] }
 0x21d   : > { %5799 = vmatprep.mubr.bf16.mxu1 %v7213_v0  ;;  %5876 = vmatpush3.bf16.msra.mxu1 %v6274_v16  ;;  %v3122_v0 = vld [vmem:[#allocation2 + $0x20] sm:$0xff] }
 0x21e   : > { %5877 = vmatprep.subr.bf16.mxu1 %v6275_v30  ;;  %v3162_v7 = vshll.u32 %v3122_v0, 16  ;;  %v3166_v24 = vshrl.u32 %v3122_v0, 16 }
 0x220   : > { %v3164_v1 = vrot.slane %v3162_v7, 1 }
 0x221   : > { %5878 = vmatpush3.bf16.msra.mxu1 %v6275_v30  ;;  %v3204_v30 = vrot.slane %v3202_v40, 1 }
 0x222   : > { %5879 = vmatprep.subr.bf16.mxu1 %v6276_v46  ;;  %v3165_v53 = vsel %vm1528_vm0, %v3160_v44, %v3164_v1  ;;  %v3168_v13 = vor.u32 %v3166_v24, %v3164_v1  ;;  %v3242_v24 = vshll.u32 %v3132_v61, 16 }
 0x224   : > { %5800 = vmatmul.mubr.bf16.gmra.mrb[60].mxu1 %v6295_v39  ;;  %v3173_v48 = vsel %vm1528_vm0, %v3168_v13, %v3172_v15  ;;  %v3206_v39 = vshrl.u32 %v3127_v29, 16  ;;  %v7404_v15 = vpop.permute.xlu0 %3609 }
 0x225   : > { %5803 = vmatprep.mubr.bf16.mxu1 %v6296_v4  ;;  %5880 = vmatpush3.bf16.msra.mxu1 %v6276_v46  ;;  %v3212_v4 = vrot.slane %v3210_v55, 1 }
 0x226   : > { %5881 = vmatprep.subr.bf16.mxu1 %v6277_v18 }
 0x227   : > { %v3216_v37 = vor.u32 %v3214_v28, %v3212_v4 }
 0x228   : > { %v7406_v62 = vpop.permute.xlu0 %3614 }
 0x229   : > { %5882 = vmatpush3.bf16.msra.mxu1 %v6277_v18  ;;  %v3129_v18 = vld [vmem:[#allocation2 + $0x58] sm:$0xff] }
 0x22a   : > { %v3222_v11 = vshrl.u32 %v3129_v18, 16 }
 0x22c   : > { %5804 = vmatmul.mubr.bf16.gmra.mrb[0].mxu1 %v6297_v33  ;;  %v3130_v33 = vld [vmem:[#allocation2 + $0x60] sm:$0xff] }
 0x22d   : > { %5807 = vmatprep.mubr.bf16.mxu1 %v6298_v10  ;;  %v3208_v10 = vor.u32 %v3206_v39, %v3204_v30  ;;  %v3226_v0 = vshll.u32 %v3130_v33, 16  ;;  %v3230_v13 = vshrl.u32 %v3130_v33, 16 }
 0x22f   : > { %v3213_v47 = vsel %vm1528_vm0, %v3208_v10, %v3212_v4  ;;  %v3228_v1 = vrot.slane %v3226_v0, 1  ;;  %v3274_v10 = vshll.u32 %v7116_v19, 16  ;;  %v3137_v0 = vld [vmem:[#allocation2 + $0x98] sm:$0x1] }
 0x231   : > { %v3232_v60 = vor.u32 %v3230_v13, %v3228_v1  ;;  %v3276_v36 = vrot.slane %v3274_v10, 1  ;;  %v6280_v13 = vld [vmem:[%s7919_s5 + $0x10] sm:$0xff]  }
 0x234   : > { %5808 = vmatmul.mubr.bf16.gmra.mrb[4].mxu1 %v6299_v8  ;;  %v3218_v8 = vshll.u32 %v3129_v18, 16 }
 0x235   : > { %5811 = vmatprep.mubr.bf16.mxu1 %v6300_v21 }
 0x236   : > { %v3220_v7 = vrot.slane %v3218_v8, 1 }
 0x238   : > { %v3224_v44 = vor.u32 %v3222_v11, %v3220_v7 }
 0x23a   : > { %v3229_v45 = vsel %vm1528_vm0, %v3224_v44, %v3228_v1  ;;  %v3278_v1 = vshrl.u32 %v7116_v19, 16 }
 0x23c   : > { %5812 = vmatmul.mubr.bf16.gmra.mrb[8].mxu1 %v6800_v6  ;;  %v3125_v6 = vld [vmem:[#allocation2 + $0x38] sm:$0xff] }
 0x23d   : > { %5815 = vmatprep.mubr.bf16.mxu1 %v6794_v23  ;;  %v3126_v23 = vld [vmem:[#allocation2 + $0x40] sm:$0xff]  ;;  %v3186_v41 = vshll.u32 %v3125_v6, 16  ;;  %v3190_v34 = vshrl.u32 %v3125_v6, 16  ;;  %v3236_v6 = vrot.slane %v3234_v51, 1 }
 0x23e   : > { %v3194_v54 = vshll.u32 %v3126_v23, 16  ;;  %v3198_v16 = vshrl.u32 %v3126_v23, 16  ;;  %v3133_v23 = vld [vmem:[#allocation2 + $0x78] sm:$0xff] }
 0x23f   : > { %v3188_v25 = vrot.slane %v3186_v41, 1  ;;  %v3244_v41 = vrot.slane %v3242_v24, 1 }
 0x240   : > { %v3196_v38 = vrot.slane %v3194_v54, 1  ;;  %v3250_v54 = vshll.u32 %v3133_v23, 16 }
 0x241   : > { %v3192_v56 = vor.u32 %v3190_v34, %v3188_v25  ;;  %v3189_v22 = vsel %vm1528_vm0, %v3184_v17, %v3188_v25  ;;  %v3237_v25 = vsel %vm1528_vm0, %v3232_v60, %v3236_v6  ;;  %v7410_v34 = vpop.permute.xlu1 %3624 }
 0x242   : > { %v3200_v46 = vor.u32 %v3198_v16, %v3196_v38  ;;  %v3252_v40 = vrot.slane %v3250_v54, 1  ;;  %v3266_v16 = vshll.u32 %v3135_v43, 16 }
 0x243   : > { %v3197_v42 = vsel %vm1528_vm0, %v3192_v56, %v3196_v38  ;;  %v3246_v38 = vshrl.u32 %v3132_v61, 16  ;;  %v6278_v56 = vld [vmem:[%s7919_s5] sm:$0xff]   ;;  %v3282_v61 = vshll.u32 %v3137_v0, 16 }
 0x244   : > { %5816 = vmatmul.mubr.bf16.gmra.mrb[12].mxu1 %v7116_v19  ;;  %v3205_v21 = vsel %vm1528_vm0, %v3200_v46, %v3204_v30  ;;  %5915 = vmatprep.subr.bf16.mxu0 %v6278_v56  ;;  %v7415_v30 = vpop.permute.xlu0 %3833  ;;  %v3268_v33 = vrot.slane %v3266_v16, 1 }
 0x245   : > { %5883 = vmatprep.mubr.bf16.mxu1 %v3165_v53  ;;  %v3221_v53 = vsel %vm1528_vm0, %v3216_v37, %v3220_v7  ;;  %5916 = vmatpush3.bf16.msra.mxu0 %v6278_v56  ;;  %7934 = vst [vmem:[#allocation3_spill] sm:$0xff] %v7415_v30  ;;  %v7417_v18 = vpop.permute.xlu1 %3838  ;;  %v3284_v24 = vrot.slane %v3282_v61, 1 }
 0x246   : > { %7935 = vst [vmem:[#allocation4_spill] sm:$0xff] %v7417_v18 }
 0x248   : > { %v7425_v28 = vpop.permute.xlu0 %3843 }
 0x249   : > { %7936 = vst [vmem:[#allocation5_spill] sm:$0xff] %v7425_v28  ;;  %v7427_v11 = vpop.permute.xlu1 %3848 }
 0x24a   : > { %7937 = vst [vmem:[#allocation6_spill] sm:$0xff] %v7427_v11 }
 0x24c   : > { %5884 = vmatmul.mubr.bf16.vlgmr.msra.gmra.mrb[16].mxu1 %v3173_v48  ;;  %v3134_v48 = vld [vmem:[#allocation2 + $0x80] sm:$0xff] }
 0x24d   : > { %5887 = vmatprep.mubr.bf16.mxu1 %v3181_v59  ;;  %v3240_v59 = vor.u32 %v3238_v27, %v3236_v6  ;;  %v3258_v29 = vshll.u32 %v3134_v48, 16  ;;  %v3262_v8 = vshrl.u32 %v3134_v48, 16  ;;  %v7437_v6 = vpop.permute.xlu1 %3634 }
 0x24f   : > { %v3245_v17 = vsel %vm1528_vm0, %v3240_v59, %v3244_v41  ;;  %v3260_v55 = vrot.slane %v3258_v29, 1 }
 0x251   : > { %v3264_v7 = vor.u32 %v3262_v8, %v3260_v55 }
 0x253   : > { %v3269_v44 = vsel %vm1528_vm0, %v3264_v7, %v3268_v33 }
 0x254   : > { %5888 = vmatmul.mubr.bf16.gmra.mrb[20].mxu1 %v3189_v22  ;;  %v3248_v22 = vor.u32 %v3246_v38, %v3244_v41 }
 0x255   : > { %5891 = vmatprep.mubr.bf16.mxu1 %v3197_v42  ;;  %v3254_v42 = vshrl.u32 %v3133_v23, 16 }
 0x256   : > { %v3253_v39 = vsel %vm1528_vm0, %v3248_v22, %v3252_v40 }
 0x257   : > { %v3256_v46 = vor.u32 %v3254_v42, %v3252_v40  ;;  %v6282_v40 = vld [vmem:[%s7919_s5 + $0x20] sm:$0xff]  }
 0x259   : > { %v3261_v4 = vsel %vm1528_vm0, %v3256_v46, %v3260_v55 }
 0x25c   : > { %5892 = vmatmul.mubr.bf16.gmra.mrb[24].mxu1 %v3205_v21  ;;  %v6279_v21 = vld [vmem:[%s7919_s5 + $0x8] sm:$0xff]  }
 0x25d   : > { %5895 = vmatprep.mubr.bf16.mxu1 %v3213_v47  ;;  %v3270_v47 = vshrl.u32 %v3135_v43, 16  ;;  %5917 = vmatprep.subr.bf16.mxu0 %v6279_v21 }
 0x25e   : > { %5918 = vmatpush3.bf16.msra.mxu0 %v6279_v21 }
 0x25f   : > { %v3272_v37 = vor.u32 %v3270_v47, %v3268_v33  ;;  %5919 = vmatprep.subr.bf16.mxu0 %v6280_v13 }
 0x261   : > { %v3277_v51 = vsel %vm1528_vm0, %v3272_v37, %v3276_v36  ;;  %v6284_v37 = vld [vmem:[%s7919_s5 + $0x30] sm:$0xff]  }
 0x262   : > { %5920 = vmatpush3.bf16.msra.mxu0 %v6280_v13 }
 0x264   : > { %5896 = vmatmul.mubr.bf16.gmra.mrb[28].mxu1 %v3221_v53  ;;  %v7432_v53 = vpop.permute.xlu0 %3629 }
 0x265   : > { %5899 = vmatprep.mubr.bf16.mxu1 %v3229_v45  ;;  %v3280_v45 = vor.u32 %v3278_v1, %v3276_v36 }
 0x267   : > { %v3285_v48 = vsel %vm1528_vm0, %v3280_v45, %v3284_v24 }
 0x268   : > { %v7449_v54 = vpop.permute.xlu0 %3639 }
 0x26c   : > { %5900 = vmatmul.mubr.bf16.gmra.mrb[32].mxu1 %v3237_v25  ;;  %v6281_v25 = vld [vmem:[%s7919_s5 + $0x18] sm:$0xff]   ;;  %v7460_v29 = vpop.permute.xlu0 %3853 }
 0x26d   : > { %5903 = vmatprep.mubr.bf16.mxu1 %v3245_v17  ;;  %5921 = vmatprep.subr.bf16.mxu0 %v6281_v25  ;;  %7938 = vst [vmem:[#allocation7_spill] sm:$0xff] %v7460_v29 }
 0x26e   : > { %5922 = vmatpush3.bf16.msra.mxu0 %v6281_v25 }
 0x26f   : > { %5923 = vmatprep.subr.bf16.mxu0 %v6282_v40 }
 0x270   : > { %v7471_v22 = vpop.permute.xlu0 %3863 }
 0x271   : > { %7940 = vst [vmem:[#allocation9_spill] sm:$0xff] %v7471_v22 }
 0x272   : > { %5924 = vmatpush3.bf16.msra.mxu0 %v6282_v40 }
 0x274   : > { %5904 = vmatmul.mubr.bf16.gmra.mrb[36].mxu1 %v3253_v39  ;;  %v7486_v33 = vpop.permute.xlu0 %3649 }
 0x275   : > { %5907 = vmatprep.mubr.bf16.mxu1 %v3261_v4  ;;  %v6283_v4 = vld [vmem:[%s7919_s5 + $0x28] sm:$0xff]  }
 0x276   : > { %5925 = vmatprep.subr.bf16.mxu0 %v6283_v4 }
 0x277   : > { %5926 = vmatpush3.bf16.msra.mxu0 %v6283_v4  ;;  %v6285_v4 = vld [vmem:[%s7919_s5 + $0x38] sm:$0xff]  }
 0x278   : > { %v7498_v7 = vpop.permute.xlu0 %3659  ;;  %5927 = vmatprep.subr.bf16.mxu0 %v6284_v37 }
 0x27b   : > { %5928 = vmatpush3.bf16.msra.mxu0 %v6284_v37 }
 0x27c   : > { %5908 = vmatmul.mubr.bf16.gmra.mrb[40].mxu1 %v3269_v44  ;;  %v7509_v44 = vpop.permute.xlu0 %3873  ;;  %5929 = vmatprep.subr.bf16.mxu0 %v6285_v4 }
 0x27d   : > { %5911 = vmatprep.mubr.bf16.mxu1 %v3277_v51  ;;  %7942 = vst [vmem:[#allocation11_spill] sm:$0xff] %v7509_v44 }
 0x27f   : > { %v5837_v60 = vpop.f32.mrb[48].mxu0  ;;  %5930 = vmatpush3.bf16.msra.mxu0 %v6285_v4 }
 0x280   : > { %v7439_v19 = vmul.f32 %v5837_v60, %v3620_v14  ;;  %v2994_v23 = vpop.f32.mrb[49].mxu0  ;;  %v7454_v14 = vpop.permute.xlu1 %3644 }
 0x281   : > { %v7442_v27 = vmul.f32 %v7404_v15, %v2994_v23  ;;  %v7444_v41 = vpop.f32.mrb[50].mxu0  ;;  %v7517_v13 = vpop.permute.xlu0 %3883 }
 0x282   : > { %v7447_v59 = vpop.f32.mrb[51].mxu0  ;;  %7944 = vst [vmem:[#allocation13_spill] sm:$0xff] %v7517_v13 }
 0x284   : > { %5912 = vmatmul.mubr.bf16.gmra.mrb[44].mxu1 %v3285_v48  ;;  %v7466_v56 = vpop.permute.xlu1 %3858 }
 0x285   : > { %7939 = vst [vmem:[#allocation8_spill] sm:$0xff] %v7466_v56  ;;  %v7532_v37 = vpop.permute.xlu0 %3669 }
 0x287   : > { %v7456_v17 = vpop.f32.mrb[52].mxu0 }
 0x288   : > { %v7458_v15 = vpop.f32.mrb[53].mxu0  ;;  %v7477_v16 = vpop.permute.xlu1 %3868 }
 0x289   : > { %v7462_v38 = vpop.f32.mrb[54].mxu0  ;;  %7941 = vst [vmem:[#allocation10_spill] sm:$0xff] %v7477_v16  ;;  %v7544_v16 = vpop.permute.xlu0 %3679 }
 0x28a   : > { %v7464_v43 = vpop.f32.mrb[55].mxu0 }
 0x28c   : > { %v7488_v10 = vpop.permute.xlu1 %3654 }
 0x28d   : > { %v7552_v11 = vpop.permute.xlu0 %3893 }
 0x28e   : > { %7956 = vst [vmem:[#allocation25_spill] sm:$0xff] %v7552_v11 }
 0x28f   : > { %v7473_v42 = vpop.f32.mrb[56].mxu0 }
 0x290   : > { %v7475_v55 = vpop.f32.mrb[57].mxu0  ;;  %v7503_v36 = vpop.permute.xlu1 %3664 }
 0x291   : > { %v7479_v46 = vpop.f32.mrb[58].mxu0 }
 0x292   : > { %v7481_v39 = vpop.f32.mrb[59].mxu0 }
 0x294   : > { %v7515_v24 = vpop.permute.xlu1 %3878 }
 0x295   : > { %7943 = vst [vmem:[#allocation12_spill] sm:$0xff] %v7515_v24 }
 0x297   : > { %v7490_v8 = vpop.f32.mrb[60].mxu0 }
 0x298   : > { %v7492_v21 = vpop.f32.mrb[61].mxu0  ;;  %v7523_v48 = vpop.permute.xlu1 %3888 }
 0x299   : > { %v7494_v47 = vpop.f32.mrb[62].mxu0  ;;  %7947 = vst [vmem:[#allocation16_spill] sm:$0xff] %v7523_v48 }
 0x29a   : > { %v7496_v0 = vpop.f32.mrb[63].mxu0 }
 0x29c   : > { %v7534_v24 = vpop.permute.xlu1 %3674 }
 0x29f   : > { %v7505_v1 = vpop.f32.mrb[64].mxu0 }
 0x2a0   : > { %v7507_v61 = vpop.f32.mrb[65].mxu0  ;;  %v7546_v29 = vpop.permute.xlu1 %3684 }
 0x2a1   : > { %v7511_v51 = vpop.f32.mrb[66].mxu0 }
 0x2a2   : > { %v7513_v45 = vpop.f32.mrb[67].mxu0 }
 0x2a4   : > { %v7558_v28 = vpop.permute.xlu1 %3898 }
 0x2a5   : > { %7959 = vst [vmem:[#allocation28_spill] sm:$0xff] %v7558_v28 }
 0x2a7   : > { %v7519_v60 = vpop.f32.mrb[68].mxu0 }
 0x2a8   : > { %7945 = vst [vmem:[#allocation14_spill] sm:$0xff] %v7519_v60  ;;  %v7521_v23 = vpop.f32.mrb[69].mxu0 }
 0x2a9   : > { %7946 = vst [vmem:[#allocation15_spill] sm:$0xff] %v7521_v23  ;;  %v7525_v25 = vpop.f32.mrb[70].mxu0 }
 0x2aa   : > { %7948 = vst [vmem:[#allocation17_spill] sm:$0xff] %v7525_v25  ;;  %v7527_v40 = vpop.f32.mrb[71].mxu0 }
 0x2ab   : > { %7949 = vst [vmem:[#allocation18_spill] sm:$0xff] %v7527_v40 }
 0x2af   : > { %v7536_v44 = vpop.f32.mrb[72].mxu0 }
 0x2b0   : > { %7950 = vst [vmem:[#allocation19_spill] sm:$0xff] %v7536_v44  ;;  %v7538_v13 = vpop.f32.mrb[73].mxu0 }
 0x2b1   : > { %7951 = vst [vmem:[#allocation20_spill] sm:$0xff] %v7538_v13  ;;  %v7540_v56 = vpop.f32.mrb[74].mxu0  ;;  %v7560_v13 = vpop.permute.xlu0 %3903 }
 0x2b2   : > { %7952 = vst [vmem:[#allocation21_spill] sm:$0xff] %v7540_v56  ;;  %v7542_v48 = vpop.f32.mrb[75].mxu0  ;;  %7960 = vst [vmem:[#allocation29_spill] sm:$0xff] %v7560_v13  ;;  %v7562_v56 = vpop.permute.xlu1 %3908 }
 0x2b3   : > { %7953 = vst [vmem:[#allocation22_spill] sm:$0xff] %v7542_v48  ;;  %7961 = vst [vmem:[#allocation30_spill] sm:$0xff] %v7562_v56 }
 0x2b5   : > { %v7564_v48 = vpop.permute.xlu0 %3689 }
 0x2b6   : > { %v7566_v44 = vpop.permute.xlu1 %3694 }
 0x2b7   : > { %v7548_v22 = vpop.f32.mrb[76].mxu0  ;;  %7962 = vst [vmem:[#allocation31_spill] sm:$0xff] %v7566_v44 }
 0x2b8   : > { %7954 = vst [vmem:[#allocation23_spill] sm:$0xff] %v7548_v22  ;;  %v7550_v18 = vpop.f32.mrb[77].mxu0 }
 0x2b9   : > { %7955 = vst [vmem:[#allocation24_spill] sm:$0xff] %v7550_v18  ;;  %v7554_v4 = vpop.f32.mrb[78].mxu0  ;;  %v7568_v40 = vpop.permute.xlu0 %3699 }
 0x2ba   : > { %7957 = vst [vmem:[#allocation26_spill] sm:$0xff] %v7554_v4  ;;  %v7556_v30 = vpop.f32.mrb[79].mxu0  ;;  %v7570_v22 = vpop.permute.xlu1 %3704 }
 0x2bb   : > { %7958 = vst [vmem:[#allocation27_spill] sm:$0xff] %v7556_v30 }
 0x2bd   : > { %v7572_v18 = vpop.permute.xlu0 %3913 }
 0x2be   : > { %7963 = vst [vmem:[#allocation32_spill] sm:$0xff] %v7572_v18  ;;  %v7574_v11 = vpop.permute.xlu1 %3918  ;;  %v3770_v18 = vmul.f32 %v7444_v41, %v7410_v34 }
 0x2bf   : > { %7964 = vst [vmem:[#allocation33_spill] sm:$0xff] %v7574_v11 }
 0x2c1   : > { %v7576_v4 = vpop.permute.xlu0 %3923 }
 0x2c2   : > { %7965 = vst [vmem:[#allocation34_spill] sm:$0xff] %v7576_v4  ;;  %v7578_v30 = vpop.permute.xlu1 %3928 }
 0x2c3   : > { %7966 = vst [vmem:[#allocation35_spill] sm:$0xff] %v7578_v30 }
 0x2c5   : > { %v7580_v28 = vpop.permute.xlu0 %3709 }
 0x2c6   : > { %7967 = vst [vmem:[#allocation36_spill] sm:$0xff] %v7580_v28  ;;  %v7582_v13 = vpop.permute.xlu1 %3714  ;;  %v3768_v28 = vmul.f32 %v7406_v62, %v7447_v59  ;;  %v3771_v59 = vmul.f32 %v7432_v53, %v7458_v15 }
 0x2c7   : > { %7968 = vst [vmem:[#allocation37_spill] sm:$0xff] %v7582_v13 }
 0x2c9   : > { %v7594_v13 = vpop.permute.xlu0 %3719 }
 0x2df   : > { %v5789_v56 = vpop.f32.mrb[48].mxu1 }
 0x2e0   : > { %v5979_v25 = vadd.f32 %v5789_v56, %v7310_v9  ;;  %v2695_v23 = vpop.f32.mrb[49].mxu1 }
 0x2e1   : > { %v5980_v60 = vadd.f32 %v2695_v23, %v7315_v5  ;;  %v5790_v44 = vpop.f32.mrb[50].mxu1  ;;  %v7602_v23 = vpop.permute.xlu1 %3724 }
 0x2e2   : > { %v7589_v11 = vadd.f32 %v5979_v25, %v7439_v19  ;;  %v5981_v4 = vadd.f32 %v5790_v44, %v7317_v50  ;;  %v2698_v30 = vpop.f32.mrb[51].mxu1  ;;  %v3773_v50 = vmul.f32 %v7456_v17, %v7449_v54 }
 0x2e3   : > { %v7597_v9 = vadd.f32 %v5980_v60, %v7442_v27  ;;  %v5982_v5 = vadd.f32 %v2698_v30, %v7319_v63  ;;  %v7611_v27 = vpop.permute.xlu0 %3933 }
 0x2e4   : > { %v7600_v56 = vadd.f32 %v5981_v4, %v3770_v18  ;;  %v3774_v18 = vmul.f32 %v7462_v38, %v7454_v14 }
 0x2e5   : > { %v7604_v34 = vadd.f32 %v5982_v5, %v3768_v28  ;;  %v7621_v54 = vpop.permute.xlu1 %3938 }
 0x2e7   : > { %v5793_v19 = vpop.f32.mrb[52].mxu1  ;;  %v7630_v25 = vpop.permute.xlu0 %3943 }
 0x2e8   : > { %v5983_v41 = vadd.f32 %v5793_v19, %v7329_v49  ;;  %v2711_v62 = vpop.f32.mrb[53].mxu1  ;;  %v3772_v49 = vmul.f32 %v7437_v6, %v7464_v43  ;;  %v3775_v6 = vmul.f32 %v7486_v33, %v7475_v55  ;;  %v3778_v19 = vmul.f32 %v7479_v46, %v7503_v36 }
 0x2e9   : > { %v5984_v63 = vadd.f32 %v2711_v62, %v7334_v35  ;;  %v5794_v30 = vpop.f32.mrb[54].mxu1  ;;  %v7637_v43 = vpop.permute.xlu1 %3948  ;;  %v3781_v46 = vmul.f32 %v7490_v8, %v7544_v16  ;;  %v3780_v16 = vmul.f32 %v7534_v24, %v7496_v0  ;;  %v3786_v0 = vmul.f32 %v7511_v51, %v7570_v22  ;;  %v7970_v22 = vld [vmem:[#allocation14_spill] sm:$0xff] }
 0x2ea   : > { %v7616_v28 = vadd.f32 %v5983_v41, %v3773_v50  ;;  %v5985_v44 = vadd.f32 %v5794_v30, %v7336_v2  ;;  %v2714_v60 = vpop.f32.mrb[55].mxu1  ;;  %v3777_v2 = vmul.f32 %v7473_v42, %v7498_v7  ;;  %v3789_v51 = vmul.f32 %v7970_v22, %v7594_v13 }
 0x2eb   : > { %v7623_v17 = vadd.f32 %v5984_v63, %v3771_v59  ;;  %v5986_v53 = vadd.f32 %v2714_v60, %v7338_v31  ;;  %v3730_v7 = vpop.permute.xlu0 %3729 }
 0x2ec   : > { %v7626_v15 = vadd.f32 %v5985_v44, %v3774_v18 }
 0x2ed   : > { %v7628_v35 = vadd.f32 %v5986_v53, %v3772_v49  ;;  %v3735_v59 = vpop.permute.xlu1 %3734 }
 0x2ef   : > { %v5797_v14 = vpop.f32.mrb[56].mxu1  ;;  %v3740_v8 = vpop.permute.xlu0 %3739 }
 0x2f0   : > { %v5987_v38 = vadd.f32 %v5797_v14, %v7342_v26  ;;  %v2727_v4 = vpop.f32.mrb[57].mxu1  ;;  %v3776_v26 = vmul.f32 %v7488_v10, %v7481_v39  ;;  %v3779_v39 = vmul.f32 %v7532_v37, %v7492_v21 }
 0x2f1   : > { %v5988_v31 = vadd.f32 %v2727_v4, %v7344_v32  ;;  %v5798_v5 = vpop.f32.mrb[58].mxu1 }
 0x2f2   : > { %v7642_v50 = vadd.f32 %v5987_v38, %v3777_v2  ;;  %v5989_v41 = vadd.f32 %v5798_v5, %v7346_v12  ;;  %v2730_v62 = vpop.f32.mrb[59].mxu1 }
 0x2f3   : > { %v7647_v42 = vadd.f32 %v5988_v31, %v3775_v6  ;;  %v5990_v55 = vadd.f32 %v2730_v62, %v7348_v52  ;;  %v3782_v52 = vmul.f32 %v7494_v47, %v7546_v29  ;;  %v3785_v29 = vmul.f32 %v7505_v1, %v7568_v40  ;;  %v7684_v2 = vpop.permute.xlu0 %3953  ;;  %v7972_v31 = vld [vmem:[#allocation36_spill] sm:$0xff] }
 0x2f4   : > { %v7650_v33 = vadd.f32 %v5989_v41, %v3778_v19  ;;  %v7973_v41 = vld [vmem:[#allocation17_spill] sm:$0xff] }
 0x2f5   : > { %v7652_v32 = vadd.f32 %v5990_v55, %v3776_v26  ;;  %v3790_v62 = vmul.f32 %v7973_v41, %v7602_v23  ;;  %v7977_v23 = vld [vmem:[#allocation20_spill] sm:$0xff] }
 0x2f6   : > { %v7981_v41 = vld [vmem:[#allocation24_spill] sm:$0xff] }
 0x2f7   : > { %v5801_v63 = vpop.f32.mrb[60].mxu1  ;;  %v7698_v19 = vpop.permute.xlu0 %3963 }
 0x2f8   : > { %v5991_v12 = vadd.f32 %v5801_v63, %v7352_v58  ;;  %v2743_v36 = vpop.f32.mrb[61].mxu1  ;;  %v7974_v63 = vld [vmem:[#allocation18_spill] sm:$0xff] }
 0x2f9   : > { %v5992_v10 = vadd.f32 %v2743_v36, %v7354_v3  ;;  %v5802_v30 = vpop.f32.mrb[62].mxu1  ;;  %v3745_v3 = vpop.permute.xlu1 %3744 }
 0x2fa   : > { %v7662_v18 = vadd.f32 %v5991_v12, %v3781_v46  ;;  %v5993_v44 = vadd.f32 %v5802_v30, %v7356_v57  ;;  %v2746_v60 = vpop.f32.mrb[63].mxu1  ;;  %v3783_v57 = vmul.f32 %v7564_v48, %v7507_v61  ;;  %v7971_v48 = vld [vmem:[#allocation15_spill] sm:$0xff]  ;;  %v7975_v46 = vld [vmem:[#allocation37_spill] sm:$0xff] }
 0x2fb   : > { %v7667_v58 = vadd.f32 %v5992_v10, %v3779_v39  ;;  %v5994_v49 = vadd.f32 %v2746_v60, %v7358_v20  ;;  %v7969_v20 = vld [vmem:[#allocation31_spill] sm:$0xff]  ;;  %v3787_v5 = vmul.f32 %v7972_v31, %v7971_v48  ;;  %v3788_v12 = vmul.f32 %v7975_v46, %v7974_v63 }
 0x2fc   : > { %v7670_v21 = vadd.f32 %v5993_v44, %v3782_v52  ;;  %v3784_v14 = vmul.f32 %v7969_v20, %v7513_v45  ;;  %v3750_v44 = vpop.permute.xlu0 %3749  ;;  %v7976_v60 = vld [vmem:[#allocation19_spill] sm:$0xff] }
 0x2fd   : > { %v7672_v37 = vadd.f32 %v5994_v49, %v3780_v16  ;;  %v7690_v40 = vpop.permute.xlu1 %3958  ;;  %v3793_v16 = vmul.f32 %v7976_v60, %v3740_v8  ;;  %v3791_v49 = vmul.f32 %v3730_v7, %v7977_v23  ;;  %v7980_v7 = vld [vmem:[#allocation23_spill] sm:$0xff] }
 0x2ff   : > { %v5805_v47 = vpop.f32.mrb[0].mxu1 }
 0x300   : > { %v7680_v24 = vadd.f32 %v5805_v47, %v3785_v29  ;;  %v2759_v53 = vpop.f32.mrb[1].mxu1  ;;  %v7978_v47 = vld [vmem:[#allocation21_spill] sm:$0xff]  ;;  %v3760_v31 = vpop.permute.xlu0 %3759 }
 0x301   : > { %v7686_v38 = vadd.f32 %v3783_v57, %v2759_v53  ;;  %v5806_v4 = vpop.f32.mrb[2].mxu1  ;;  %v7706_v36 = vpop.permute.xlu1 %3968 }
 0x302   : > { %v7688_v6 = vadd.f32 %v5806_v4, %v3786_v0  ;;  %v2762_v1 = vpop.f32.mrb[3].mxu1  ;;  %v3794_v0 = vmul.f32 %v7978_v47, %v3745_v3  ;;  %v7984_v47 = vld [vmem:[#allocation5_spill] sm:$0xff] }
 0x303   : > { %v7692_v61 = vadd.f32 %v3784_v14, %v2762_v1  ;;  %v7979_v14 = vld [vmem:[#allocation22_spill] sm:$0xff] }
 0x304   : > { %v3792_v4 = vmul.f32 %v3735_v59, %v7979_v14  ;;  %v7985_v14 = vld [vmem:[#allocation3_spill] sm:$0xff] }
 0x305   : > { %v3755_v29 = vpop.permute.xlu1 %3754 }
 0x307   : > { %v5809_v45 = vpop.f32.mrb[4].mxu1 }
 0x308   : > { %v7702_v26 = vadd.f32 %v5809_v45, %v3789_v51  ;;  %v2775_v55 = vpop.f32.mrb[5].mxu1  ;;  %v3797_v45 = vmul.f32 %v7980_v7, %v3760_v31 }
 0x309   : > { %v7708_v39 = vadd.f32 %v3787_v5, %v2775_v55  ;;  %v5810_v13 = vpop.f32.mrb[6].mxu1  ;;  %v3765_v8 = vpop.permute.xlu1 %3764  ;;  %v7982_v55 = vld [vmem:[#allocation26_spill] sm:$0xff] }
 0x30a   : > { %v7710_v10 = vadd.f32 %v5810_v13, %v3790_v62  ;;  %v2778_v30 = vpop.f32.mrb[7].mxu1  ;;  %v3795_v62 = vmul.f32 %v3750_v44, %v7981_v41  ;;  %v3798_v63 = vmul.f32 %v7982_v55, %v3765_v8 }
 0x30b   : > { %v7712_v52 = vadd.f32 %v3788_v12, %v2778_v30  ;;  %v7983_v12 = vld [vmem:[#allocation27_spill] sm:$0xff] }
 0x30c   : > { %v3796_v13 = vmul.f32 %v3755_v29, %v7983_v12 }
 0x30f   : > { %v5813_v57 = vpop.f32.mrb[8].mxu1 }
 0x310   : > { %v7717_v53 = vadd.f32 %v5813_v57, %v3793_v16  ;;  %v2791_v20 = vpop.f32.mrb[9].mxu1 }
 0x311   : > { %v7720_v1 = vadd.f32 %v3791_v49, %v2791_v20  ;;  %v5814_v22 = vpop.f32.mrb[10].mxu1  ;;  %v7742_v20 = vld [vmem:[%s7918_s4] ss:$0 sm:$0xff] }
 0x312   : > { %v7722_v51 = vadd.f32 %v5814_v22, %v3794_v0  ;;  %v2794_v48 = vpop.f32.mrb[11].mxu1 }
 0x313   : > { %v7724_v5 = vadd.f32 %v3792_v4, %v2794_v48  ;;  %v7986_v48 = vld [vmem:[#allocation6_spill] sm:$0xff] }
 0x317   : > { %v5817_v3 = vpop.f32.mrb[12].mxu1 }
 0x318   : > { %v7729_v46 = vadd.f32 %v5817_v3, %v3797_v45  ;;  %v2807_v59 = vpop.f32.mrb[13].mxu1  ;;  %v7987_v45 = vld [vmem:[#allocation4_spill] sm:$0xff] }
 0x319   : > { %v7732_v30 = vadd.f32 %v3795_v62, %v2807_v59  ;;  %v5818_v60 = vpop.f32.mrb[14].mxu1 }
 0x31a   : > { %v7734_v16 = vadd.f32 %v5818_v60, %v3798_v63  ;;  %v2810_v23 = vpop.f32.mrb[15].mxu1 }
 0x31b   : > { %v7736_v49 = vadd.f32 %v3796_v13, %v2810_v23  ;;  %v7988_v23 = vld [vmem:[#allocation9_spill] sm:$0xff] }
 0x31f   : > { %v5885_v57 = vpop.f32.mrb[16].mxu1 }
 0x320   : > { %v3993_v0 = vmul.f32 %v5885_v57, %v7984_v47  ;;  %v3384_v44 = vpop.f32.mrb[17].mxu1 }
 0x321   : > { %v3991_v4 = vmul.f32 %v7985_v14, %v3384_v44  ;;  %v5886_v29 = vpop.f32.mrb[18].mxu1  ;;  %v7989_v44 = vld [vmem:[#allocation7_spill] sm:$0xff] }
 0x322   : > { %v4025_v22 = vadd.f32 %v3993_v0, %v7589_v11  ;;  %v3994_v31 = vmul.f32 %v5886_v29, %v7986_v48  ;;  %v3387_v8 = vpop.f32.mrb[19].mxu1 }
 0x323   : > { %v4023_v7 = vadd.f32 %v3991_v4, %v7597_v9  ;;  %v3992_v41 = vmul.f32 %v7987_v45, %v3387_v8  ;;  %v7991_v8 = vld [vmem:[#allocation8_spill] sm:$0xff] }
 0x324   : > { %v4064_v62 = vadd.f32 %v7742_v20, %v4025_v22  ;;  %v4026_v3 = vadd.f32 %v3994_v31, %v7600_v56  ;;  %v7990_v22 = vld [vmem:[#allocation10_spill] sm:$0xff] }
 0x325   : > { %v4062_v55 = vadd.f32 %v7742_v20, %v4023_v7  ;;  %v4024_v63 = vadd.f32 %v3992_v41, %v7604_v34 }
 0x326   : > { %v4065_v59 = vadd.f32 %v7742_v20, %v4026_v3  ;;  %v4096_v13 = vmax.f32 %v4064_v62, 0.0 }
 0x327   : > { %v4063_v12 = vadd.f32 %v7742_v20, %v4024_v63  ;;  %v5889_v11 = vpop.f32.mrb[20].mxu1  ;;  %v4094_v47 = vmax.f32 %v4062_v55, 0.0 }
 0x328   : > { %v4097_v60 = vmax.f32 %v4065_v59, 0.0  ;;  %v3997_v57 = vmul.f32 %v5889_v11, %v7988_v23  ;;  %v3400_v9 = vpop.f32.mrb[21].mxu1  ;;  %v7992_v11 = vld [vmem:[#allocation13_spill] sm:$0xff] }
 0x329   : > { %v4095_v0 = vmax.f32 %v4063_v12, 0.0  ;;  %v3995_v14 = vmul.f32 %v7989_v44, %v3400_v9  ;;  %v5890_v4 = vpop.f32.mrb[22].mxu1  ;;  %v7993_v9 = vld [vmem:[#allocation11_spill] sm:$0xff] }
 0x32a   : > { %v4127_v56 = vpack.c.bf16 %v4097_v60, %v4096_v13  ;;  %v4029_v29 = vadd.f32 %v3997_v57, %v7616_v28  ;;  %v3998_v34 = vmul.f32 %v5890_v4, %v7990_v22  ;;  %v3403_v48 = vpop.f32.mrb[23].mxu1 }
 0x32b   : > { %v4027_v31 = vadd.f32 %v3995_v14, %v7623_v17  ;;  %v3996_v7 = vmul.f32 %v7991_v8, %v3403_v48  ;;  %v4126_v45 = vpack.c.bf16 %v4095_v0, %v4094_v47 }
 0x32c   : > { %v4068_v41 = vadd.f32 %v7742_v20, %v4029_v29  ;;  %v4030_v62 = vadd.f32 %v3998_v34, %v7626_v15  ;;  %v7995_v29 = vld [vmem:[#allocation12_spill] sm:$0xff] }
 0x32d   : > { %v4066_v3 = vadd.f32 %v7742_v20, %v4027_v31  ;;  %v4028_v55 = vadd.f32 %v3996_v7, %v7628_v35  ;;  %5931 = vmatprep.mubr.bf16.mxu0 %v4126_v45  ;;  %v7994_v35 = vld [vmem:[#allocation16_spill] sm:$0xff] }
 0x32e   : > { %v4069_v63 = vadd.f32 %v7742_v20, %v4030_v62  ;;  %5932 = vmatmul.mubr.bf16.vlgmr.msra.gmra.mrb[80].mxu0 %v4127_v56  ;;  %v4100_v12 = vmax.f32 %v4068_v41, 0.0 }
 0x32f   : > { %v4067_v28 = vadd.f32 %v7742_v20, %v4028_v55  ;;  %v5893_v59 = vpop.f32.mrb[24].mxu1  ;;  %v4098_v23 = vmax.f32 %v4066_v3, 0.0  ;;  %v7996_v3 = vld [vmem:[#allocation29_spill] sm:$0xff] }
 0x330   : > { %v4101_v17 = vmax.f32 %v4069_v63, 0.0  ;;  %v4001_v13 = vmul.f32 %v5893_v59, %v7992_v11  ;;  %v3416_v60 = vpop.f32.mrb[25].mxu1 }
 0x331   : > { %v4099_v57 = vmax.f32 %v4067_v28, 0.0  ;;  %v3999_v15 = vmul.f32 %v7993_v9, %v3416_v60  ;;  %v5894_v47 = vpop.f32.mrb[26].mxu1  ;;  %v7999_v9 = vld [vmem:[#allocation28_spill] sm:$0xff] }
 0x332   : > { %v4033_v0 = vadd.f32 %v4001_v13, %v7642_v50  ;;  %v4002_v44 = vmul.f32 %v5894_v47, %v7994_v35  ;;  %v3419_v14 = vpop.f32.mrb[27].mxu1  ;;  %v4129_v4 = vpack.c.bf16 %v4101_v17, %v4100_v12  ;;  %v7997_v12 = vld [vmem:[#allocation25_spill] sm:$0xff] }
 0x333   : > { %v4031_v56 = vadd.f32 %v3999_v15, %v7647_v42  ;;  %v4000_v22 = vmul.f32 %v7995_v29, %v3419_v14  ;;  %v4128_v34 = vpack.c.bf16 %v4099_v57, %v4098_v23 }
 0x334   : > { %v4072_v48 = vadd.f32 %v7742_v20, %v4033_v0  ;;  %v4034_v31 = vadd.f32 %v4002_v44, %v7650_v33 }
 0x335   : > { %v4070_v8 = vadd.f32 %v7742_v20, %v4031_v56  ;;  %v4032_v7 = vadd.f32 %v4000_v22, %v7652_v32  ;;  %5935 = vmatprep.mubr.bf16.mxu0 %v4128_v34  ;;  %v7998_v32 = vld [vmem:[#allocation30_spill] sm:$0xff] }
 0x336   : > { %v4073_v50 = vadd.f32 %v7742_v20, %v4034_v31  ;;  %5936 = vmatmul.mubr.bf16.gmra.mrb[84].mxu0 %v4129_v4  ;;  %v4104_v62 = vmax.f32 %v4072_v48, 0.0  ;;  %v8000_v22 = vld [vmem:[#allocation34_spill] sm:$0xff] }
 0x337   : > { %v4071_v45 = vadd.f32 %v7742_v20, %v4032_v7  ;;  %v5897_v41 = vpop.f32.mrb[28].mxu1  ;;  %v4102_v28 = vmax.f32 %v4070_v8, 0.0  ;;  %v8001_v7 = vld [vmem:[#allocation32_spill] sm:$0xff] }
 0x338   : > { %v4105_v42 = vmax.f32 %v4073_v50, 0.0  ;;  %v4005_v55 = vmul.f32 %v5897_v41, %v7996_v3  ;;  %v3432_v63 = vpop.f32.mrb[29].mxu1 }
 0x339   : > { %v4103_v59 = vmax.f32 %v4071_v45, 0.0  ;;  %v4003_v33 = vmul.f32 %v7997_v12, %v3432_v63  ;;  %v5898_v17 = vpop.f32.mrb[30].mxu1 }
 0x33a   : > { %v4037_v11 = vadd.f32 %v4005_v55, %v7662_v18  ;;  %v4006_v13 = vmul.f32 %v5898_v17, %v7998_v32  ;;  %v3435_v60 = vpop.f32.mrb[31].mxu1  ;;  %v4131_v23 = vpack.c.bf16 %v4105_v42, %v4104_v62  ;;  %v8003_v55 = vld [vmem:[#allocation33_spill] sm:$0xff] }
 0x33b   : > { %v4035_v57 = vadd.f32 %v4003_v33, %v7667_v58  ;;  %v4004_v15 = vmul.f32 %v7999_v9, %v3435_v60  ;;  %v4130_v47 = vpack.c.bf16 %v4103_v59, %v4102_v28 }
 0x33c   : > { %v4076_v0 = vadd.f32 %v7742_v20, %v4037_v11  ;;  %v4038_v35 = vadd.f32 %v4006_v13, %v7670_v21 }
 0x33d   : > { %v4074_v44 = vadd.f32 %v7742_v20, %v4035_v57  ;;  %v4036_v14 = vadd.f32 %v4004_v15, %v7672_v37  ;;  %5939 = vmatprep.mubr.bf16.mxu0 %v4130_v47  ;;  %v8002_v37 = vld [vmem:[#allocation35_spill] sm:$0xff] }
 0x33e   : > { %v4077_v18 = vadd.f32 %v7742_v20, %v4038_v35  ;;  %5940 = vmatmul.mubr.bf16.gmra.mrb[88].mxu0 %v4131_v23  ;;  %v4108_v29 = vmax.f32 %v4076_v0, 0.0 }
 0x33f   : > { %v4075_v4 = vadd.f32 %v7742_v20, %v4036_v14  ;;  %v5901_v56 = vpop.f32.mrb[32].mxu1  ;;  %v4106_v31 = vmax.f32 %v4074_v44, 0.0 }
 0x340   : > { %v4109_v58 = vmax.f32 %v4077_v18, 0.0  ;;  %v4009_v34 = vmul.f32 %v5901_v56, %v8000_v22  ;;  %v3448_v48 = vpop.f32.mrb[33].mxu1 }
 0x341   : > { %v4107_v8 = vmax.f32 %v4075_v4, 0.0  ;;  %v4007_v21 = vmul.f32 %v8001_v7, %v3448_v48  ;;  %v5902_v50 = vpop.f32.mrb[34].mxu1 }
 0x342   : > { %v4041_v45 = vadd.f32 %v4009_v34, %v7680_v24  ;;  %v4010_v41 = vmul.f32 %v5902_v50, %v8002_v37  ;;  %v3451_v62 = vpop.f32.mrb[35].mxu1  ;;  %v4133_v42 = vpack.c.bf16 %v4109_v58, %v4108_v29  ;;  %v3974_v34 = vpop.permute.xlu0 %3973 }
 0x343   : > { %v4039_v3 = vadd.f32 %v4007_v21, %v7686_v38  ;;  %v4008_v63 = vmul.f32 %v8003_v55, %v3451_v62  ;;  %v4132_v28 = vpack.c.bf16 %v4107_v8, %v4106_v31 }
 0x344   : > { %v4080_v59 = vadd.f32 %v7742_v20, %v4041_v45  ;;  %v4042_v12 = vadd.f32 %v4010_v41, %v7688_v6  ;;  %v3979_v45 = vpop.permute.xlu1 %3978 }
 0x345   : > { %v4078_v33 = vadd.f32 %v7742_v20, %v4039_v3  ;;  %v4040_v17 = vadd.f32 %v4008_v63, %v7692_v61  ;;  %5943 = vmatprep.mubr.bf16.mxu0 %v4132_v28 }
 0x346   : > { %v4081_v24 = vadd.f32 %v7742_v20, %v4042_v12  ;;  %5944 = vmatmul.mubr.bf16.gmra.mrb[92].mxu0 %v4133_v42  ;;  %v4112_v13 = vmax.f32 %v4080_v59, 0.0 }
 0x347   : > { %v4079_v11 = vadd.f32 %v7742_v20, %v4040_v17  ;;  %v5905_v32 = vpop.f32.mrb[36].mxu1  ;;  %v4110_v57 = vmax.f32 %v4078_v33, 0.0 }
 0x348   : > { %v4113_v38 = vmax.f32 %v4081_v24, 0.0  ;;  %v4013_v60 = vmul.f32 %v5905_v32, %v7630_v25  ;;  %v3464_v23 = vpop.f32.mrb[37].mxu1  ;;  %v3989_v12 = vpop.permute.xlu1 %3988 }
 0x349   : > { %v4111_v9 = vmax.f32 %v4079_v11, 0.0  ;;  %v4011_v6 = vmul.f32 %v7611_v27, %v3464_v23  ;;  %v5906_v15 = vpop.f32.mrb[38].mxu1 }
 0x34a   : > { %v4045_v47 = vadd.f32 %v4013_v60, %v7702_v26  ;;  %v4014_v61 = vmul.f32 %v5906_v15, %v7637_v43  ;;  %v3467_v0 = vpop.f32.mrb[39].mxu1  ;;  %v4135_v35 = vpack.c.bf16 %v4113_v38, %v4112_v13 }
 0x34b   : > { %v4043_v44 = vadd.f32 %v4011_v6, %v7708_v39  ;;  %v4012_v14 = vmul.f32 %v7621_v54, %v3467_v0  ;;  %v4134_v18 = vpack.c.bf16 %v4111_v9, %v4110_v57 }
 0x34c   : > { %v4084_v4 = vadd.f32 %v7742_v20, %v4045_v47  ;;  %v4046_v25 = vadd.f32 %v4014_v61, %v7710_v10 }
 0x34d   : > { %v4082_v56 = vadd.f32 %v7742_v20, %v4043_v44  ;;  %v4044_v27 = vadd.f32 %v4012_v14, %v7712_v52  ;;  %5947 = vmatprep.mubr.bf16.mxu0 %v4134_v18  ;;  %v4998_v18 = vld [vmem:[%s6385_s20] sm:$0xff]  }
 0x34e   : > { %v4085_v26 = vadd.f32 %v7742_v20, %v4046_v25  ;;  %5948 = vmatmul.mubr.bf16.gmra.mrb[96].mxu0 %v4135_v35  ;;  %v4116_v58 = vmax.f32 %v4084_v4, 0.0 }
 0x34f   : > { %v4083_v43 = vadd.f32 %v7742_v20, %v4044_v27  ;;  %v5909_v29 = vpop.f32.mrb[40].mxu1  ;;  %v4114_v48 = vmax.f32 %v4082_v56, 0.0 }
 0x350   : > { %v4117_v39 = vmax.f32 %v4085_v26, 0.0  ;;  %v4017_v54 = vmul.f32 %v5909_v29, %v7698_v19  ;;  %v3480_v22 = vpop.f32.mrb[41].mxu1 }
 0x351   : > { %v4115_v31 = vmax.f32 %v4083_v43, 0.0  ;;  %v4015_v10 = vmul.f32 %v7684_v2, %v3480_v22  ;;  %v5910_v8 = vpop.f32.mrb[42].mxu1 }
 0x352   : > { %v4049_v52 = vadd.f32 %v4017_v54, %v7717_v53  ;;  %v4018_v7 = vmul.f32 %v5910_v8, %v7706_v36  ;;  %v3483_v21 = vpop.f32.mrb[43].mxu1  ;;  %v4137_v50 = vpack.c.bf16 %v4117_v39, %v4116_v58  ;;  %v3984_v36 = vpop.permute.xlu0 %3983  ;;  %v5000_v58 = vunpack.c.h.bf16 %v4998_v18  ;;  %v5142_v8 = vld [vmem:[%s6385_s20 + $0x10] sm:$0xff]  }
 0x353   : > { %v4047_v37 = vadd.f32 %v4015_v10, %v7720_v1  ;;  %v4016_v41 = vmul.f32 %v7690_v40, %v3483_v21  ;;  %v4136_v62 = vpack.c.bf16 %v4115_v31, %v4114_v48  ;;  %v5143_v31 = vld [vmem:[%s6385_s20 + $0x18] sm:$0xff]  }
 0x354   : > { %v4088_v19 = vadd.f32 %v7742_v20, %v4049_v52  ;;  %v4050_v42 = vadd.f32 %v4018_v7, %v7722_v51 }
 0x355   : > { %v4086_v3 = vadd.f32 %v7742_v20, %v4047_v37  ;;  %v4048_v2 = vadd.f32 %v4016_v41, %v7724_v5  ;;  %5951 = vmatprep.mubr.bf16.mxu0 %v4136_v62  ;;  %v5007_v62 = vunpack.c.l.bf16 %v5142_v8 }
 0x356   : > { %v4089_v53 = vadd.f32 %v7742_v20, %v4050_v42  ;;  %5952 = vmatmul.mubr.bf16.gmra.mrb[100].mxu0 %v4137_v50  ;;  %v4120_v1 = vmax.f32 %v4088_v19, 0.0  ;;  %v5011_v50 = vunpack.c.l.bf16 %v5143_v31 }
 0x357   : > { %v4087_v55 = vadd.f32 %v7742_v20, %v4048_v2  ;;  %v5913_v63 = vpop.f32.mrb[44].mxu1  ;;  %v4118_v33 = vmax.f32 %v4086_v3, 0.0  ;;  %v5012_v2 = vunpack.c.h.bf16 %v5143_v31 }
 0x358   : > { %v4121_v28 = vmax.f32 %v4089_v53, 0.0  ;;  %v4021_v40 = vmul.f32 %v5913_v63, %v3984_v36  ;;  %v3496_v59 = vpop.f32.mrb[45].mxu1  ;;  %v5008_v63 = vunpack.c.h.bf16 %v5142_v8 }
 0x359   : > { %v4119_v17 = vmax.f32 %v4087_v55, 0.0  ;;  %v4019_v51 = vmul.f32 %v3974_v34, %v3496_v59  ;;  %v5914_v24 = vpop.f32.mrb[46].mxu1 }
 0x35a   : > { %v4053_v11 = vadd.f32 %v4021_v40, %v7729_v46  ;;  %v4022_v5 = vmul.f32 %v5914_v24, %v3989_v12  ;;  %v3499_v32 = vpop.f32.mrb[47].mxu1  ;;  %v4139_v13 = vpack.c.bf16 %v4121_v28, %v4120_v1 }
 0x35b   : > { %v4051_v38 = vadd.f32 %v4019_v51, %v7732_v30  ;;  %v4020_v60 = vmul.f32 %v3979_v45, %v3499_v32  ;;  %v4138_v23 = vpack.c.bf16 %v4119_v17, %v4118_v33  ;;  %v5145_v33 = vld [vmem:[%s6385_s20 + $0x28] sm:$0xff]   ;;  %v5144_v51 = vld [vmem:[%s6385_s20 + $0x20] sm:$0xff]  }
 0x35c   : > { %v4092_v57 = vadd.f32 %v7742_v20, %v4053_v11  ;;  %v4054_v9 = vadd.f32 %v4022_v5, %v7734_v16  ;;  %v5141_v16 = vld [vmem:[%s6385_s20 + $0x8] sm:$0xff]   ;;  %v5019_v32 = vunpack.c.l.bf16 %v5145_v33 }
 0x35d   : > { %v4090_v6 = vadd.f32 %v7742_v20, %v4051_v38  ;;  %v4052_v15 = vadd.f32 %v4020_v60, %v7736_v49  ;;  %5955 = vmatprep.mubr.bf16.mxu0 %v4138_v23  ;;  %v7840_v49 = vld [vmem:[%s7920_s6] ss:$0 sm:$0xff]  ;;  %v5003_v4 = vunpack.c.l.bf16 %v5141_v16  ;;  %v5004_v26 = vunpack.c.h.bf16 %v5141_v16 }
 0x35e   : > { %v4093_v46 = vadd.f32 %v7742_v20, %v4054_v9  ;;  %5956 = vmatmul.mubr.bf16.gmra.mrb[104].mxu0 %v4139_v13  ;;  %v4124_v61 = vmax.f32 %v4092_v57, 0.0  ;;  %v5015_v23 = vunpack.c.l.bf16 %v5144_v51 }
 0x35f   : > { %v4091_v47 = vadd.f32 %v7742_v20, %v4052_v15  ;;  %v4122_v0 = vmax.f32 %v4090_v6, 0.0  ;;  %v4999_v20 = vunpack.c.l.bf16 %v4998_v18  ;;  %v5020_v15 = vunpack.c.h.bf16 %v5145_v33  ;;  %v5147_v18 = vld [vmem:[%s6385_s20 + $0x38] sm:$0xff]  }
 0x360   : > { %v4125_v30 = vmax.f32 %v4093_v46, 0.0 }
 0x361   : > { %v4123_v35 = vmax.f32 %v4091_v47, 0.0 }
 0x362   : > { %v4141_v44 = vpack.c.bf16 %v4125_v30, %v4124_v61  ;;  %v5016_v30 = vunpack.c.h.bf16 %v5144_v51 }
 0x363   : > { %v4140_v14 = vpack.c.bf16 %v4123_v35, %v4122_v0 }
 0x365   : > { %5959 = vmatprep.mubr.bf16.mxu0 %v4140_v14 }
 0x366   : > { %5960 = vmatmul.mubr.bf16.gmra.mrb[108].mxu0 %v4141_v44 }
 0x401   : > { %v5933_v25 = vpop.f32.mrb[80].mxu0 }
 0x402   : > { %v4256_v56 = vadd.f32 %v5933_v25, %v7840_v49  ;;  %v4247_v27 = vpop.f32.mrb[81].mxu0  ;;  %v5146_v25 = vld [vmem:[%s6385_s20 + $0x30] sm:$0xff]  }
 0x403   : > { %v4248_v43 = vadd.f32 %v7840_v49, %v4247_v27  ;;  %v5934_v29 = vpop.f32.mrb[82].mxu0 }
 0x404   : > { %v4440_v39 = vadd.f32 %v5003_v4, %v4256_v56  ;;  %v4259_v54 = vadd.f32 %v5934_v29, %v7840_v49  ;;  %v4250_v22 = vpop.f32.mrb[83].mxu0 }
 0x405   : > { %v4438_v34 = vadd.f32 %v4999_v20, %v4248_v43  ;;  %v4251_v48 = vadd.f32 %v7840_v49, %v4250_v22 }
 0x406   : > { %v4441_v10 = vadd.f32 %v5004_v26, %v4259_v54  ;;  %v4472_v7 = vmax.f32 %v4440_v39, 0.0  ;;  %v5027_v26 = vunpack.c.l.bf16 %v5147_v18  ;;  %v5023_v39 = vunpack.c.l.bf16 %v5146_v25 }
 0x407   : > { %v4439_v52 = vadd.f32 %v5000_v58, %v4251_v48  ;;  %v4470_v45 = vmax.f32 %v4438_v34, 0.0  ;;  %v5028_v48 = vunpack.c.h.bf16 %v5147_v18 }
 0x408   : > { %v4473_v21 = vmax.f32 %v4441_v10, 0.0 }
 0x409   : > { %v4471_v37 = vmax.f32 %v4439_v52, 0.0  ;;  %v5937_v41 = vpop.f32.mrb[84].mxu0  ;;  %v5024_v52 = vunpack.c.h.bf16 %v5146_v25 }
 0x40a   : > { %v5069_v19 = vpack.c.bf16 %v4473_v21, %v4472_v7  ;;  %v4272_v42 = vadd.f32 %v5937_v41, %v7840_v49  ;;  %v4263_v3 = vpop.f32.mrb[85].mxu0  ;;  %v5149_v41 = vld [vmem:[%s6385_s20 + $0x48] sm:$0xff]  }
 0x40b   : > { %v5064_v53 = vpack.c.bf16 %v4471_v37, %v4470_v45  ;;  %v4264_v36 = vadd.f32 %v7840_v49, %v4263_v3  ;;  %v5938_v55 = vpop.f32.mrb[86].mxu0 }
 0x40c   : > { %5156 = vst [vmem:[%s7853_s21 + $0x8] sm:$0xff] %v5069_v19   ;;  %v4444_v1 = vadd.f32 %v5011_v50, %v4272_v42  ;;  %v4275_v28 = vadd.f32 %v5938_v55, %v7840_v49  ;;  %v4266_v40 = vpop.f32.mrb[87].mxu0  ;;  %v5148_v19 = vld [vmem:[%s6385_s20 + $0x40] sm:$0xff]  }
 0x40d   : > { %5065 = vst [vmem:[%s7853_s21] sm:$0xff] %v5064_v53   ;;  %v4442_v59 = vadd.f32 %v5007_v62, %v4264_v36  ;;  %v4267_v12 = vadd.f32 %v7840_v49, %v4266_v40  ;;  %v5035_v53 = vunpack.c.l.bf16 %v5149_v41 }
 0x40e   : > { %v4445_v17 = vadd.f32 %v5012_v2, %v4275_v28  ;;  %v4476_v11 = vmax.f32 %v4444_v1, 0.0  ;;  %v5031_v1 = vunpack.c.l.bf16 %v5148_v19 }
 0x40f   : > { %v4443_v24 = vadd.f32 %v5008_v63, %v4267_v12  ;;  %v4474_v13 = vmax.f32 %v4442_v59, 0.0  ;;  %v5036_v12 = vunpack.c.h.bf16 %v5149_v41 }
 0x410   : > { %v4477_v5 = vmax.f32 %v4445_v17, 0.0 }
 0x411   : > { %v4475_v38 = vmax.f32 %v4443_v24, 0.0  ;;  %v5941_v60 = vpop.f32.mrb[88].mxu0  ;;  %v5032_v24 = vunpack.c.h.bf16 %v5148_v19 }
 0x412   : > { %v5079_v57 = vpack.c.bf16 %v4477_v5, %v4476_v11  ;;  %v4288_v9 = vadd.f32 %v5941_v60, %v7840_v49  ;;  %v4279_v6 = vpop.f32.mrb[89].mxu0  ;;  %v5151_v60 = vld [vmem:[%s6385_s20 + $0x58] sm:$0xff]  }
 0x413   : > { %v5074_v46 = vpack.c.bf16 %v4475_v38, %v4474_v13  ;;  %v4280_v47 = vadd.f32 %v7840_v49, %v4279_v6  ;;  %v5942_v61 = vpop.f32.mrb[90].mxu0 }
 0x414   : > { %5158 = vst [vmem:[%s7853_s21 + $0x18] sm:$0xff] %v5079_v57   ;;  %v4448_v0 = vadd.f32 %v5019_v32, %v4288_v9  ;;  %v4291_v35 = vadd.f32 %v5942_v61, %v7840_v49  ;;  %v4282_v44 = vpop.f32.mrb[91].mxu0  ;;  %v5150_v57 = vld [vmem:[%s6385_s20 + $0x50] sm:$0xff]  }
 0x415   : > { %5157 = vst [vmem:[%s7853_s21 + $0x10] sm:$0xff] %v5074_v46   ;;  %v4446_v14 = vadd.f32 %v5015_v23, %v4280_v47  ;;  %v4283_v16 = vadd.f32 %v7840_v49, %v4282_v44  ;;  %v5043_v46 = vunpack.c.l.bf16 %v5151_v60 }
 0x416   : > { %v4449_v4 = vadd.f32 %v5020_v15, %v4291_v35  ;;  %v4480_v56 = vmax.f32 %v4448_v0, 0.0  ;;  %v5039_v0 = vunpack.c.l.bf16 %v5150_v57 }
 0x417   : > { %v4447_v20 = vadd.f32 %v5016_v30, %v4283_v16  ;;  %v4478_v43 = vmax.f32 %v4446_v14, 0.0  ;;  %v5044_v16 = vunpack.c.h.bf16 %v5151_v60 }
 0x418   : > { %v4481_v27 = vmax.f32 %v4449_v4, 0.0 }
 0x419   : > { %v4479_v29 = vmax.f32 %v4447_v20, 0.0  ;;  %v5945_v58 = vpop.f32.mrb[92].mxu0  ;;  %v5040_v20 = vunpack.c.h.bf16 %v5150_v57 }
 0x41a   : > { %v5089_v54 = vpack.c.bf16 %v4481_v27, %v4480_v56  ;;  %v4304_v22 = vadd.f32 %v5945_v58, %v7840_v49  ;;  %v4295_v34 = vpop.f32.mrb[93].mxu0  ;;  %v5153_v58 = vld [vmem:[%s6385_s20 + $0x68] sm:$0xff]  }
 0x41b   : > { %v5084_v31 = vpack.c.bf16 %v4479_v29, %v4478_v43  ;;  %v4296_v10 = vadd.f32 %v7840_v49, %v4295_v34  ;;  %v5946_v8 = vpop.f32.mrb[94].mxu0 }
 0x41c   : > { %5160 = vst [vmem:[%s7853_s21 + $0x28] sm:$0xff] %v5089_v54   ;;  %v4452_v7 = vadd.f32 %v5027_v26, %v4304_v22  ;;  %v4307_v21 = vadd.f32 %v5946_v8, %v7840_v49  ;;  %v4298_v50 = vpop.f32.mrb[95].mxu0  ;;  %v5152_v54 = vld [vmem:[%s6385_s20 + $0x60] sm:$0xff]  }
 0x41d   : > { %5159 = vst [vmem:[%s7853_s21 + $0x20] sm:$0xff] %v5084_v31   ;;  %v4450_v45 = vadd.f32 %v5023_v39, %v4296_v10  ;;  %v4299_v37 = vadd.f32 %v7840_v49, %v4298_v50  ;;  %v5051_v31 = vunpack.c.l.bf16 %v5153_v58 }
 0x41e   : > { %v4453_v62 = vadd.f32 %v5028_v48, %v4307_v21  ;;  %v4484_v3 = vmax.f32 %v4452_v7, 0.0  ;;  %v5047_v7 = vunpack.c.l.bf16 %v5152_v54 }
 0x41f   : > { %v4451_v42 = vadd.f32 %v5024_v52, %v4299_v37  ;;  %v4482_v36 = vmax.f32 %v4450_v45, 0.0  ;;  %v5052_v37 = vunpack.c.h.bf16 %v5153_v58 }
 0x420   : > { %v4485_v2 = vmax.f32 %v4453_v62, 0.0 }
 0x421   : > { %v4483_v55 = vmax.f32 %v4451_v42, 0.0  ;;  %v5949_v63 = vpop.f32.mrb[96].mxu0  ;;  %v5048_v42 = vunpack.c.h.bf16 %v5152_v54 }
 0x422   : > { %v5099_v28 = vpack.c.bf16 %v4485_v2, %v4484_v3  ;;  %v4320_v40 = vadd.f32 %v5949_v63, %v7840_v49  ;;  %v4311_v59 = vpop.f32.mrb[97].mxu0  ;;  %v5155_v63 = vld [vmem:[%s6385_s20 + $0x78] sm:$0xff]  }
 0x423   : > { %v5094_v33 = vpack.c.bf16 %v4483_v55, %v4482_v36  ;;  %v4312_v17 = vadd.f32 %v7840_v49, %v4311_v59  ;;  %v5950_v51 = vpop.f32.mrb[98].mxu0 }
 0x424   : > { %5162 = vst [vmem:[%s7853_s21 + $0x38] sm:$0xff] %v5099_v28   ;;  %v4456_v11 = vadd.f32 %v5035_v53, %v4320_v40  ;;  %v4323_v5 = vadd.f32 %v5950_v51, %v7840_v49  ;;  %v4314_v32 = vpop.f32.mrb[99].mxu0  ;;  %v5154_v28 = vld [vmem:[%s6385_s20 + $0x70] sm:$0xff]  }
 0x425   : > { %5161 = vst [vmem:[%s7853_s21 + $0x30] sm:$0xff] %v5094_v33   ;;  %v4454_v13 = vadd.f32 %v5031_v1, %v4312_v17  ;;  %v4315_v38 = vadd.f32 %v7840_v49, %v4314_v32  ;;  %v5059_v33 = vunpack.c.l.bf16 %v5155_v63 }
 0x426   : > { %v4457_v23 = vadd.f32 %v5036_v12, %v4323_v5  ;;  %v4488_v6 = vmax.f32 %v4456_v11, 0.0  ;;  %v5055_v11 = vunpack.c.l.bf16 %v5154_v28 }
 0x427   : > { %v4455_v9 = vadd.f32 %v5032_v24, %v4315_v38  ;;  %v4486_v47 = vmax.f32 %v4454_v13, 0.0  ;;  %v5060_v38 = vunpack.c.h.bf16 %v5155_v63 }
 0x428   : > { %v4489_v15 = vmax.f32 %v4457_v23, 0.0 }
 0x429   : > { %v4487_v61 = vmax.f32 %v4455_v9, 0.0  ;;  %v5953_v30 = vpop.f32.mrb[100].mxu0  ;;  %v5056_v9 = vunpack.c.h.bf16 %v5154_v28 }
 0x42a   : > { %v5109_v35 = vpack.c.bf16 %v4489_v15, %v4488_v6  ;;  %v4336_v44 = vadd.f32 %v5953_v30, %v7840_v49  ;;  %v4327_v14 = vpop.f32.mrb[101].mxu0 }
 0x42b   : > { %v5104_v18 = vpack.c.bf16 %v4487_v61, %v4486_v47  ;;  %v4328_v4 = vadd.f32 %v7840_v49, %v4327_v14  ;;  %v5954_v25 = vpop.f32.mrb[102].mxu0 }
 0x42c   : > { %5164 = vst [vmem:[%s7853_s21 + $0x48] sm:$0xff] %v5109_v35   ;;  %v4460_v56 = vadd.f32 %v5043_v46, %v4336_v44  ;;  %v4339_v27 = vadd.f32 %v5954_v25, %v7840_v49  ;;  %v4330_v26 = vpop.f32.mrb[103].mxu0 }
 0x42d   : > { %5163 = vst [vmem:[%s7853_s21 + $0x40] sm:$0xff] %v5104_v18   ;;  %v4458_v43 = vadd.f32 %v5039_v0, %v4328_v4  ;;  %v4331_v29 = vadd.f32 %v7840_v49, %v4330_v26 }
 0x42e   : > { %v4461_v39 = vadd.f32 %v5044_v16, %v4339_v27  ;;  %v4492_v34 = vmax.f32 %v4460_v56, 0.0 }
 0x42f   : > { %v4459_v22 = vadd.f32 %v5040_v20, %v4331_v29  ;;  %v4490_v10 = vmax.f32 %v4458_v43, 0.0 }
 0x430   : > { %v4493_v48 = vmax.f32 %v4461_v39, 0.0 }
 0x431   : > { %v4491_v8 = vmax.f32 %v4459_v22, 0.0  ;;  %v5957_v52 = vpop.f32.mrb[104].mxu0 }
 0x432   : > { %v5119_v21 = vpack.c.bf16 %v4493_v48, %v4492_v34  ;;  %v4352_v50 = vadd.f32 %v5957_v52, %v7840_v49  ;;  %v4343_v45 = vpop.f32.mrb[105].mxu0 }
 0x433   : > { %v5114_v41 = vpack.c.bf16 %v4491_v8, %v4490_v10  ;;  %v4344_v62 = vadd.f32 %v7840_v49, %v4343_v45  ;;  %v5958_v19 = vpop.f32.mrb[106].mxu0 }
 0x434   : > { %5166 = vst [vmem:[%s7853_s21 + $0x58] sm:$0xff] %v5119_v21   ;;  %v4464_v3 = vadd.f32 %v5051_v31, %v4352_v50  ;;  %v4355_v2 = vadd.f32 %v5958_v19, %v7840_v49  ;;  %v4346_v53 = vpop.f32.mrb[107].mxu0 }
 0x435   : > { %5165 = vst [vmem:[%s7853_s21 + $0x50] sm:$0xff] %v5114_v41   ;;  %v4462_v36 = vadd.f32 %v5047_v7, %v4344_v62  ;;  %v4347_v55 = vadd.f32 %v7840_v49, %v4346_v53 }
 0x436   : > { %v4465_v1 = vadd.f32 %v5052_v37, %v4355_v2  ;;  %v4496_v59 = vmax.f32 %v4464_v3, 0.0 }
 0x437   : > { %v4463_v40 = vadd.f32 %v5048_v42, %v4347_v55  ;;  %v4494_v17 = vmax.f32 %v4462_v36, 0.0 }
 0x438   : > { %v4497_v12 = vmax.f32 %v4465_v1, 0.0 }
 0x439   : > { %v4495_v51 = vmax.f32 %v4463_v40, 0.0  ;;  %v5961_v24 = vpop.f32.mrb[108].mxu0 }
 0x43a   : > { %v5129_v5 = vpack.c.bf16 %v4497_v12, %v4496_v59  ;;  %v4368_v32 = vadd.f32 %v5961_v24, %v7840_v49  ;;  %v4359_v13 = vpop.f32.mrb[109].mxu0 }
 0x43b   : > { %v5124_v60 = vpack.c.bf16 %v4495_v51, %v4494_v17  ;;  %v4360_v23 = vadd.f32 %v7840_v49, %v4359_v13  ;;  %v5962_v57 = vpop.f32.mrb[110].mxu0 }
 0x43c   : > { %5168 = vst [vmem:[%s7853_s21 + $0x68] sm:$0xff] %v5129_v5   ;;  %v4468_v6 = vadd.f32 %v5059_v33, %v4368_v32  ;;  %v4371_v15 = vadd.f32 %v5962_v57, %v7840_v49  ;;  %v4362_v46 = vpop.f32.mrb[111].mxu0 }
 0x43d   : > { %5167 = vst [vmem:[%s7853_s21 + $0x60] sm:$0xff] %v5124_v60   ;;  %v4466_v47 = vadd.f32 %v5055_v11, %v4360_v23  ;;  %v4363_v61 = vadd.f32 %v7840_v49, %v4362_v46 }
 0x43e   : > { %v4469_v30 = vadd.f32 %v5060_v38, %v4371_v15  ;;  %v4500_v35 = vmax.f32 %v4468_v6, 0.0 }
 0x43f   : > { %v4467_v0 = vadd.f32 %v5056_v9, %v4363_v61  ;;  %v4498_v14 = vmax.f32 %v4466_v47, 0.0 }
 0x440   : > { %v4501_v44 = vmax.f32 %v4469_v30, 0.0 }
 0x441   : > { %v4499_v16 = vmax.f32 %v4467_v0, 0.0 }
 0x442   : > { %v5139_v18 = vpack.c.bf16 %v4501_v44, %v4500_v35 }
 0x443   : > { %v5134_v4 = vpack.c.bf16 %v4499_v16, %v4498_v14 }
 0x444   : > { %5170 = vst [vmem:[%s7853_s21 + $0x78] sm:$0xff] %v5139_v18  }
 0x445   : > { %5169 = vst [vmem:[%s7853_s21 + $0x70] sm:$0xff] %v5134_v4  }
 0x446 PF: > { %s19_s30 = sadd.s32 1, %s6307_s30  }
 0x447   : > { %p16_p4 = scmp.ge.s32.totalorder %s19_s30, 4  }
 0x449   :  { %18 = sbr.rel (!%p16_p4) target bundleno = 1 (0x1), region = 88 }

</bundles_post_ra>
